<compile_context>
chip_gen: v6e
topology: v6e:2x2x1
jax: 0.10.0
libtpu: 0.0.40
codegen_flags: <defaults>
</compile_context>

<pallas_src>
import functools
import math

import jax
import jax.numpy as jnp
from jax import lax
from jax.experimental import pallas as pl
from jax.experimental.pallas import tpu as pltpu

_LN_EPS = 1e-5


# ---------------------------------------------------------------------------
# Fused EncoderLayer kernel (one batch-block of Bb elements per grid step)
# ---------------------------------------------------------------------------
def _encoder_layer_kernel(x_ref, wqkv_ref, bqkv_ref, wo_ref, bo_ref,
                          g1_ref, be1_ref, w1_ref, bf1_ref, w2_ref, bf2_ref,
                          g2_ref, be2_ref, o_ref, *, num_heads):
    Bb, S, D = x_ref.shape
    H = num_heads
    hd = D // H
    cdt = wqkv_ref.dtype                   # MXU operand dtype (f32 or bf16); accumulation is f32

    x = x_ref[...].reshape(Bb * S, D)       # (R, D) f32 rows = batch*seq, kept f32 for residual/LN
    xc = x.astype(cdt)

    # ---- fused QKV projection: one (R, D) @ (D, 3D) MXU matmul (Q scale folded on the host) ----
    qkv = jnp.dot(xc, wqkv_ref[...], preferred_element_type=jnp.float32) + bqkv_ref[...]   # (R, 3D)

    # ---- split into per-(batch, head) tiles: (Bb*H, S, hd) with a leading batch dim ----
    def gather_heads(t):                    # t: 0=Q, 1=K, 2=V (column blocks chosen on the host)
        tiles = [qkv[b * S:(b + 1) * S, t * D + h * hd: t * D + (h + 1) * hd]
                 for b in range(Bb) for h in range(H)]
        return jnp.stack(tiles).astype(cdt)   # single cast right before the MXU ops (v5e-safe)

    q = gather_heads(0)
    k = gather_heads(1)
    v = gather_heads(2)

    # ---- attention: batched over (batch*head); softmax math stays f32; K never transposed ----
    s = lax.dot_general(q, k, (((2,), (2,)), ((0,), (0,))),
                        preferred_element_type=jnp.float32)              # (Bb*H, S, S)
    m = jnp.max(s, axis=-1, keepdims=True)
    e = jnp.exp(s - m)
    denom = jnp.sum(e, axis=-1, keepdims=True)                           # (Bb*H, S, 1)
    vals = lax.dot_general(e.astype(cdt), v, (((2,), (1,)), ((0,), (0,))),
                           preferred_element_type=jnp.float32)           # (Bb*H, S, hd)
    # exact normalization folded AFTER attn@v (cheaper than scaling the (BH,S,S) scores)
    vals = vals / denom

    # ---- head relayout (lane concat; XLU-side copies) + single (R, D) @ (D, D) output proj ----
    rows = [jnp.concatenate([vals[b * H + h] for h in range(H)], axis=-1) for b in range(Bb)]
    vals2 = rows[0] if Bb == 1 else jnp.concatenate(rows, axis=0)        # (R, D)
    attn_out = jnp.dot(vals2.astype(cdt), wo_ref[...],
                       preferred_element_type=jnp.float32) + bo_ref[...]  # (R, D)

    # ---- residual + LayerNorm 1 (f32) ----
    h1 = attn_out + x
    mu = jnp.mean(h1, axis=-1, keepdims=True)
    var = jnp.mean((h1 - mu) ** 2, axis=-1, keepdims=True)
    h1 = g1_ref[...] * ((h1 - mu) * lax.rsqrt(var + _LN_EPS)) + be1_ref[...]

    # ---- FFN (dropout = identity at inference) ----
    f = jnp.dot(h1.astype(cdt), w1_ref[...],
                preferred_element_type=jnp.float32) + bf1_ref[...]       # (R, Hff)
    f = jnp.maximum(f, 0.0)
    f = jnp.dot(f.astype(cdt), w2_ref[...],
                preferred_element_type=jnp.float32) + bf2_ref[...]       # (R, D)

    # ---- residual + LayerNorm 2 (f32) ----
    h2 = f + h1
    mu2 = jnp.mean(h2, axis=-1, keepdims=True)
    var2 = jnp.mean((h2 - mu2) ** 2, axis=-1, keepdims=True)
    out = g2_ref[...] * ((h2 - mu2) * lax.rsqrt(var2 + _LN_EPS)) + be2_ref[...]

    o_ref[...] = out.reshape(Bb, S, D).astype(o_ref.dtype)


# ---------------------------------------------------------------------------
# Host-side weight preparation (pre-transpose / head re-arrangement / scale fold)
# ---------------------------------------------------------------------------
def _prep_layer_params(p, num_heads, compute_dtype, qkv_layout="interleaved"):
    D = p["wout"].shape[0]
    H = num_heads
    hd = D // H
    scale = 1.0 / math.sqrt(hd)

    wqkv, bqkv = p["wqkv"], p["bqkv"]          # (3D, D), (3D,)
    if qkv_layout == "interleaved":            # rows [q_h|k_h|v_h] per head (module's reshape+chunk intent)
        w4 = wqkv.reshape(H, 3, hd, D)
        b3 = bqkv.reshape(H, 3, hd)
        wq, wk, wv = w4[:, 0], w4[:, 1], w4[:, 2]      # (H, hd, D)
        bq, bk, bv = b3[:, 0], b3[:, 1], b3[:, 2]      # (H, hd)
    elif qkv_layout == "blocked":              # rows [all-Q; all-K; all-V] (standard fused checkpoints)
        w4 = wqkv.reshape(3, H, hd, D)
        b3 = bqkv.reshape(3, H, hd)
        wq, wk, wv = w4[0], w4[1], w4[2]
        bq, bk, bv = b3[0], b3[1], b3[2]
    else:
        raise ValueError(f"unknown qkv_layout: {qkv_layout}")

    def to_cols(w):                            # (H, hd, D_in) -> (D_in, H*hd) kernel column layout
        return jnp.transpose(w.reshape(H * hd, D))

    # kernel fused-QKV weight: (D, 3D), columns [Q | K | V], head-major inside each block;
    # the 1/sqrt(hd) attention scale is folded into the Q columns and bias.
    wqkv_k = jnp.concatenate([to_cols(wq) * scale, to_cols(wk), to_cols(wv)], axis=1)
    bqkv_k = jnp.concatenate([bq.reshape(-1) * scale, bk.reshape(-1), bv.reshape(-1)]).reshape(1, 3 * D)

    wout_t = p["wout"].T                       # (D, D); input features already in head-concat order
    bout = p["bout"].reshape(1, D)
    w1_t = p["w1"].T                           # (D, Hff)
    b1 = p["b1"].reshape(1, -1)
    w2_t = p["w2"].T                           # (Hff, D)
    b2 = p["b2"].reshape(1, D)
    g1, be1 = p["g1"].reshape(1, D), p["beta1"].reshape(1, D)
    g2, be2 = p["g2"].reshape(1, D), p["beta2"].reshape(1, D)

    cd = compute_dtype
    f32 = jnp.float32
    return (wqkv_k.astype(cd), bqkv_k.astype(f32),
            wout_t.astype(cd), bout.astype(f32),
            g1.astype(f32), be1.astype(f32),
            w1_t.astype(cd), b1.astype(f32),
            w2_t.astype(cd), b2.astype(f32),
            g2.astype(f32), be2.astype(f32))


def _weight_spec(shape, single_buffer):
    nd = len(shape)
    idx = lambda b, _nd=nd: (0,) * _nd         # constant block index across the grid
    if single_buffer:
        # weights never change across grid steps -> no pipelining needed; halves resident weight VMEM
        return pl.BlockSpec(tuple(shape), idx, pipeline_mode=pl.Buffered(1))
    return pl.BlockSpec(tuple(shape), idx)


def _choose_batch_block(B, S, target_rows=256):
    """Largest divisor Bb of B s.t. the grid keeps >=2 parallel steps when B>=2 (v7x: 2 TCs)
    while Bb*S rows approach an MXU-friendly M."""
    best = 1
    for bb in range(1, B + 1):
        if B % bb:
            continue
        if B >= 2 and B // bb < 2:
            continue
        if bb * S <= max(target_rows, S):
            best = bb
    return best


def _vmem_cap_bytes():
    try:
        cap = int(pltpu.get_tpu_info().vmem_capacity_bytes)
    except Exception:                           # conservative default = v7x physical VMEM
        cap = 64 * 1024 * 1024
    return (cap * 3) // 4                       # ~25% headroom for compiler scratch / semaphores


def _vmem_limit_bytes(Bb, S, D, H, Hff, x_itemsize, prepped, compute_dtype):
    hd = D // H
    cb = jnp.dtype(compute_dtype).itemsize
    f32 = 4
    io = 2 * 2 * Bb * S * D * x_itemsize                           # double-buffered x & out blocks
    w = sum(int(a.size) * a.dtype.itemsize for a in prepped)       # single-buffered weights
    inter = 0
    inter += Bb * S * 3 * D * (f32 + cb)                           # fused qkv (f32 acc + cdt operand)
    inter += 3 * Bb * H * S * hd * (f32 + cb)                      # q / k / v head stacks
    inter += Bb * H * S * S * (2 * f32 + cb)                       # scores, exp(scores), cdt copy
    inter += Bb * H * S * hd * 2 * f32                             # attn@v + normalized values
    inter += Bb * S * D * (2 * f32 + cb)                           # head-concat values + attn_out
    inter += Bb * S * Hff * (f32 + cb)                             # FFN hidden
    inter += 4 * Bb * S * D * f32                                  # h1 / h2 / LN temps / out
    est = io + w + inter + (2 << 20)
    return int(min(max(est, 4 << 20), _vmem_cap_bytes()))


# ---------------------------------------------------------------------------
# Wrappers
# ---------------------------------------------------------------------------
def encoder_layer(x, params, *, num_heads, compute_dtype=jnp.float32, qkv_layout="interleaved"):
    """One fused EncoderLayer. x: (B, S, D) float32 -> (B, S, D)."""
    B, S, D = x.shape
    Hff = params["w1"].shape[0]
    prepped = _prep_layer_params(params, num_heads, compute_dtype, qkv_layout)

    Bb = _choose_batch_block(B, S)
    grid = (B // Bb,)
    x_spec = pl.BlockSpec((Bb, S, D), lambda b: (b, 0, 0))
    out_spec = pl.BlockSpec((Bb, S, D), lambda b: (b, 0, 0))
    vmem_limit = _vmem_limit_bytes(Bb, S, D, num_heads, Hff, x.dtype.itemsize, prepped, compute_dtype)

    kernel = functools.partial(_encoder_layer_kernel, num_heads=num_heads)

    def build(single_buffer_weights):
        in_specs = [x_spec] + [_weight_spec(a.shape, single_buffer_weights) for a in prepped]
        return pl.pallas_call(
            kernel,
            out_shape=jax.ShapeDtypeStruct((B, S, D), x.dtype),
            grid_spec=pltpu.PrefetchScalarGridSpec(
                num_scalar_prefetch=0,
                grid=grid,
                in_specs=in_specs,
                out_specs=out_spec,
            ),
            compiler_params=pltpu.CompilerParams(
                dimension_semantics=("parallel",),
                vmem_limit_bytes=vmem_limit,
            ),
        )

    try:
        return build(True)(x, *prepped)
    except Exception:
        # TODO(synk): drop this fallback once pl.Buffered(1) single-buffered weight specs are
        # confirmed on the deployed jax/Mosaic version; semantics are identical either way.
        return build(False)(x, *prepped)


def encoder_forward(x, layer_params_list, *, num_heads, compute_dtype=jnp.float32,
                    qkv_layout="interleaved"):
    """Encoder: stack of fused EncoderLayer Pallas kernels."""
    for p in layer_params_list:
        x = encoder_layer(x, p, num_heads=num_heads, compute_dtype=compute_dtype,
                          qkv_layout=qkv_layout)
    return x


# ---------------------------------------------------------------------------
# Pure-JAX reference (mirrors the intended PyTorch semantics)
# ---------------------------------------------------------------------------
def _ln_ref(z, g, b, eps=_LN_EPS):
    mu = jnp.mean(z, axis=-1, keepdims=True)
    var = jnp.mean((z - mu) ** 2, axis=-1, keepdims=True)
    return g * (z - mu) / jnp.sqrt(var + eps) + b


def _reference_layer(x, p, num_heads):
    B, S, D = x.shape
    hd = D // num_heads
    qkv = jnp.einsum("bsd,ed->bse", x, p["wqkv"]) + p["bqkv"]                 # (B, S, 3D)
    qkv = qkv.reshape(B, S, num_heads, 3 * hd).transpose(0, 2, 1, 3)
    q, k, v = jnp.split(qkv, 3, axis=-1)                                      # (B, H, S, hd)
    scores = jnp.einsum("bhqd,bhkd->bhqk", q, k) / math.sqrt(hd)
    attn = jax.nn.softmax(scores, axis=-1)
    vals = jnp.einsum("bhqk,bhkd->bhqd", attn, v).transpose(0, 2, 1, 3).reshape(B, S, D)
    attn_out = jnp.einsum("bsd,ed->bse", vals, p["wout"]) + p["bout"]
    h1 = _ln_ref(attn_out + x, p["g1"], p["beta1"])
    f = jnp.maximum(jnp.einsum("bsd,hd->bsh", h1, p["w1"]) + p["b1"], 0.0)
    f = jnp.einsum("bsh,dh->bsd", f, p["w2"]) + p["b2"]
    return _ln_ref(f + h1, p["g2"], p["beta2"])


def _reference_encoder(x, layer_params_list, num_heads):
    for p in layer_params_list:
        x = _reference_layer(x, p, num_heads)
    return x


# ---------------------------------------------------------------------------
# Parameter init (PyTorch nn.Linear defaults) and self-test
# ---------------------------------------------------------------------------
def init_layer_params(key, d_model, ffn_hidden):
    def linear(k, out_f, in_f):
        bound = 1.0 / math.sqrt(in_f)
        kw, kb = jax.random.split(k)
        w = jax.random.uniform(kw, (out_f, in_f), jnp.float32, -bound, bound)
        b = jax.random.uniform(kb, (out_f,), jnp.float32, -bound, bound)
        return w, b

    ks = jax.random.split(key, 4)
    wqkv, bqkv = linear(ks[0], 3 * d_model, d_model)
    wout, bout = linear(ks[1], d_model, d_model)
    w1, b1 = linear(ks[2], ffn_hidden, d_model)
    w2, b2 = linear(ks[3], d_model, ffn_hidden)
    return dict(wqkv=wqkv, bqkv=bqkv, wout=wout, bout=bout,
                g1=jnp.ones((d_model,), jnp.float32), beta1=jnp.zeros((d_model,), jnp.float32),
                w1=w1, b1=b1, w2=w2, b2=b2,
                g2=jnp.ones((d_model,), jnp.float32), beta2=jnp.zeros((d_model,), jnp.float32))


if __name__ == "__main__":
    # Small shapes consistent with the module: d_model=32, num_heads=4, seq=8, batch=2,
    # ffn_hidden=64, num_layers=2.
    B, S, D, H, HFF, L = 2, 8, 32, 4, 64, 2

    key = jax.random.PRNGKey(0)
    kx, kp = jax.random.split(key)
    x = jax.random.normal(kx, (B, S, D), dtype=jnp.float32)
    params = [init_layer_params(k, D, HFF) for k in jax.random.split(kp, L)]

    ref = _reference_encoder(x, params, H)

    # f32 matmul-operand path.
    out = jax.block_until_ready(encoder_forward(x, params, num_heads=H))
    assert out.shape == (B, S, D)
    assert bool(jnp.all(jnp.isfinite(out)))
    assert jnp.allclose(out, ref, atol=1e-2, rtol=1e-2), "f32 kernel mismatch vs JAX reference"

    # bf16 matmul-operand path (MXU throughput dtype on v5e/v6e/v7x); loose tolerance.
    out_bf16 = jax.block_until_ready(
        encoder_forward(x, params, num_heads=H, compute_dtype=jnp.bfloat16))
    assert bool(jnp.all(jnp.isfinite(out_bf16)))
    assert jnp.allclose(out_bf16, ref, atol=2e-1, rtol=2e-1), "bf16 kernel mismatch vs JAX reference"

    print("KERNEL_OK")
</pallas_src>

<mosaic_0001>
module attributes {stable_mosaic.version = 11 : i64} {
  func.func @_encoder_layer_kernel(%arg0: i32, %arg1: memref<1x8x32xf32, #tpu.memory_space<vmem>>, %arg2: memref<32x96xf32, #tpu.memory_space<vmem>>, %arg3: memref<1x96xf32, #tpu.memory_space<vmem>>, %arg4: memref<32x32xf32, #tpu.memory_space<vmem>>, %arg5: memref<1x32xf32, #tpu.memory_space<vmem>>, %arg6: memref<1x32xf32, #tpu.memory_space<vmem>>, %arg7: memref<1x32xf32, #tpu.memory_space<vmem>>, %arg8: memref<32x64xf32, #tpu.memory_space<vmem>>, %arg9: memref<1x64xf32, #tpu.memory_space<vmem>>, %arg10: memref<64x32xf32, #tpu.memory_space<vmem>>, %arg11: memref<1x32xf32, #tpu.memory_space<vmem>>, %arg12: memref<1x32xf32, #tpu.memory_space<vmem>>, %arg13: memref<1x32xf32, #tpu.memory_space<vmem>>, %arg14: memref<1x8x32xf32, #tpu.memory_space<vmem>>) attributes {dimension_semantics = [#tpu.dimension_semantics<parallel>], iteration_bounds = array<i64: 2>, scalar_prefetch = 0 : i64, scratch_operands = 0 : i64, tpu.core_type = #tpu.core_type<tc>, window_params = [{transform_indices = @transform_0, window_bounds = array<i64: 1, 8, 32>}, {pipeline_mode = #tpu.pipeline_mode<synchronous>, transform_indices = @transform_1, window_bounds = array<i64: 32, 96>}, {pipeline_mode = #tpu.pipeline_mode<synchronous>, transform_indices = @transform_2, window_bounds = array<i64: 1, 96>}, {pipeline_mode = #tpu.pipeline_mode<synchronous>, transform_indices = @transform_3, window_bounds = array<i64: 32, 32>}, {pipeline_mode = #tpu.pipeline_mode<synchronous>, transform_indices = @transform_4, window_bounds = array<i64: 1, 32>}, {pipeline_mode = #tpu.pipeline_mode<synchronous>, transform_indices = @transform_5, window_bounds = array<i64: 1, 32>}, {pipeline_mode = #tpu.pipeline_mode<synchronous>, transform_indices = @transform_6, window_bounds = array<i64: 1, 32>}, {pipeline_mode = #tpu.pipeline_mode<synchronous>, transform_indices = @transform_7, window_bounds = array<i64: 32, 64>}, {pipeline_mode = #tpu.pipeline_mode<synchronous>, transform_indices = @transform_8, window_bounds = array<i64: 1, 64>}, {pipeline_mode = #tpu.pipeline_mode<synchronous>, transform_indices = @transform_9, window_bounds = array<i64: 64, 32>}, {pipeline_mode = #tpu.pipeline_mode<synchronous>, transform_indices = @transform_10, window_bounds = array<i64: 1, 32>}, {pipeline_mode = #tpu.pipeline_mode<synchronous>, transform_indices = @transform_11, window_bounds = array<i64: 1, 32>}, {pipeline_mode = #tpu.pipeline_mode<synchronous>, transform_indices = @transform_12, window_bounds = array<i64: 1, 32>}, {transform_indices = @transform_13, window_bounds = array<i64: 1, 8, 32>}]} {
    %c0 = arith.constant 0 : index
    %c0_0 = arith.constant 0 : index
    %c0_1 = arith.constant 0 : index
    %0 = vector.load %arg1[%c0, %c0_0, %c0_1] : memref<1x8x32xf32, #tpu.memory_space<vmem>>, vector<1x8x32xf32>
    %1 = vector.shape_cast %0 : vector<1x8x32xf32> to vector<8x32xf32>
    %c0_2 = arith.constant 0 : index
    %c0_3 = arith.constant 0 : index
    %2 = vector.load %arg2[%c0_2, %c0_3] : memref<32x96xf32, #tpu.memory_space<vmem>>, vector<32x96xf32>
    %cst = arith.constant dense<0.000000e+00> : vector<8x96xf32>
    %3 = tpu.matmul %1, %2, %cst {dimension_numbers = #tpu.dot_dimension_numbers<[1], [0], [0], [1], [0, 0, 1, 1], [], []>} : vector<8x32xf32>, vector<32x96xf32>, vector<8x96xf32> -> vector<8x96xf32>
    %c0_4 = arith.constant 0 : index
    %c0_5 = arith.constant 0 : index
    %4 = vector.load %arg3[%c0_4, %c0_5] : memref<1x96xf32, #tpu.memory_space<vmem>>, vector<1x96xf32>
    %5 = vector.broadcast %4 : vector<1x96xf32> to vector<8x96xf32>
    %6 = arith.addf %3, %5 : vector<8x96xf32>
    %7 = vector.extract_strided_slice %6 {offsets = [0, 0], sizes = [8, 8], strides = [1, 1]} : vector<8x96xf32> to vector<8x8xf32>
    %8 = vector.extract_strided_slice %6 {offsets = [0, 8], sizes = [8, 8], strides = [1, 1]} : vector<8x96xf32> to vector<8x8xf32>
    %9 = vector.extract_strided_slice %6 {offsets = [0, 16], sizes = [8, 8], strides = [1, 1]} : vector<8x96xf32> to vector<8x8xf32>
    %10 = vector.extract_strided_slice %6 {offsets = [0, 24], sizes = [8, 8], strides = [1, 1]} : vector<8x96xf32> to vector<8x8xf32>
    %11 = vector.shape_cast %7 : vector<8x8xf32> to vector<1x8x8xf32>
    %12 = vector.shape_cast %8 : vector<8x8xf32> to vector<1x8x8xf32>
    %13 = vector.shape_cast %9 : vector<8x8xf32> to vector<1x8x8xf32>
    %14 = vector.shape_cast %10 : vector<8x8xf32> to vector<1x8x8xf32>
    %15 = tpu.concatenate %11, %12, %13, %14 in 0 : vector<1x8x8xf32>, vector<1x8x8xf32>, vector<1x8x8xf32>, vector<1x8x8xf32> -> vector<4x8x8xf32>
    %16 = vector.extract_strided_slice %6 {offsets = [0, 32], sizes = [8, 8], strides = [1, 1]} : vector<8x96xf32> to vector<8x8xf32>
    %17 = vector.extract_strided_slice %6 {offsets = [0, 40], sizes = [8, 8], strides = [1, 1]} : vector<8x96xf32> to vector<8x8xf32>
    %18 = vector.extract_strided_slice %6 {offsets = [0, 48], sizes = [8, 8], strides = [1, 1]} : vector<8x96xf32> to vector<8x8xf32>
    %19 = vector.extract_strided_slice %6 {offsets = [0, 56], sizes = [8, 8], strides = [1, 1]} : vector<8x96xf32> to vector<8x8xf32>
    %20 = vector.shape_cast %16 : vector<8x8xf32> to vector<1x8x8xf32>
    %21 = vector.shape_cast %17 : vector<8x8xf32> to vector<1x8x8xf32>
    %22 = vector.shape_cast %18 : vector<8x8xf32> to vector<1x8x8xf32>
    %23 = vector.shape_cast %19 : vector<8x8xf32> to vector<1x8x8xf32>
    %24 = tpu.concatenate %20, %21, %22, %23 in 0 : vector<1x8x8xf32>, vector<1x8x8xf32>, vector<1x8x8xf32>, vector<1x8x8xf32> -> vector<4x8x8xf32>
    %25 = vector.extract_strided_slice %6 {offsets = [0, 64], sizes = [8, 8], strides = [1, 1]} : vector<8x96xf32> to vector<8x8xf32>
    %26 = vector.extract_strided_slice %6 {offsets = [0, 72], sizes = [8, 8], strides = [1, 1]} : vector<8x96xf32> to vector<8x8xf32>
    %27 = vector.extract_strided_slice %6 {offsets = [0, 80], sizes = [8, 8], strides = [1, 1]} : vector<8x96xf32> to vector<8x8xf32>
    %28 = vector.extract_strided_slice %6 {offsets = [0, 88], sizes = [8, 8], strides = [1, 1]} : vector<8x96xf32> to vector<8x8xf32>
    %29 = vector.shape_cast %25 : vector<8x8xf32> to vector<1x8x8xf32>
    %30 = vector.shape_cast %26 : vector<8x8xf32> to vector<1x8x8xf32>
    %31 = vector.shape_cast %27 : vector<8x8xf32> to vector<1x8x8xf32>
    %32 = vector.shape_cast %28 : vector<8x8xf32> to vector<1x8x8xf32>
    %33 = tpu.concatenate %29, %30, %31, %32 in 0 : vector<1x8x8xf32>, vector<1x8x8xf32>, vector<1x8x8xf32>, vector<1x8x8xf32> -> vector<4x8x8xf32>
    %cst_6 = arith.constant dense<0.000000e+00> : vector<4x8x8xf32>
    %34 = tpu.matmul %15, %24, %cst_6 {dimension_numbers = #tpu.dot_dimension_numbers<[2], [2], [1], [1], [0, 0, 0, 1, 1, 1], [0], [0]>} : vector<4x8x8xf32>, vector<4x8x8xf32>, vector<4x8x8xf32> -> vector<4x8x8xf32>
    %cst_7 = arith.constant dense<0xFF800000> : vector<4x8xf32>
    %35 = vector.multi_reduction <maximumf>, %34, %cst_7 [2] : vector<4x8x8xf32> to vector<4x8xf32>
    %36 = vector.shape_cast %35 : vector<4x8xf32> to vector<4x8x1xf32>
    %37 = vector.broadcast %36 : vector<4x8x1xf32> to vector<4x8x8xf32>
    %38 = arith.subf %34, %37 : vector<4x8x8xf32>
    %39 = math.exp %38 : vector<4x8x8xf32>
    %cst_8 = arith.constant dense<0.000000e+00> : vector<4x8xf32>
    %40 = vector.multi_reduction <add>, %39, %cst_8 [2] : vector<4x8x8xf32> to vector<4x8xf32>
    %41 = vector.shape_cast %40 : vector<4x8xf32> to vector<4x8x1xf32>
    %cst_9 = arith.constant dense<0.000000e+00> : vector<4x8x8xf32>
    %42 = tpu.matmul %39, %33, %cst_9 {dimension_numbers = #tpu.dot_dimension_numbers<[2], [1], [1], [2], [0, 0, 0, 1, 1, 2], [0], [0]>} : vector<4x8x8xf32>, vector<4x8x8xf32>, vector<4x8x8xf32> -> vector<4x8x8xf32>
    %43 = vector.broadcast %41 : vector<4x8x1xf32> to vector<4x8x8xf32>
    %44 = arith.divf %42, %43 : vector<4x8x8xf32>
    %45 = vector.extract_strided_slice %44 {offsets = [0, 0, 0], sizes = [1, 8, 8], strides = [1, 1, 1]} : vector<4x8x8xf32> to vector<1x8x8xf32>
    %46 = vector.shape_cast %45 : vector<1x8x8xf32> to vector<8x8xf32>
    %47 = vector.extract_strided_slice %44 {offsets = [1, 0, 0], sizes = [1, 8, 8], strides = [1, 1, 1]} : vector<4x8x8xf32> to vector<1x8x8xf32>
    %48 = vector.shape_cast %47 : vector<1x8x8xf32> to vector<8x8xf32>
    %49 = vector.extract_strided_slice %44 {offsets = [2, 0, 0], sizes = [1, 8, 8], strides = [1, 1, 1]} : vector<4x8x8xf32> to vector<1x8x8xf32>
    %50 = vector.shape_cast %49 : vector<1x8x8xf32> to vector<8x8xf32>
    %51 = vector.extract_strided_slice %44 {offsets = [3, 0, 0], sizes = [1, 8, 8], strides = [1, 1, 1]} : vector<4x8x8xf32> to vector<1x8x8xf32>
    %52 = vector.shape_cast %51 : vector<1x8x8xf32> to vector<8x8xf32>
    %53 = tpu.concatenate %46, %48, %50, %52 in 1 : vector<8x8xf32>, vector<8x8xf32>, vector<8x8xf32>, vector<8x8xf32> -> vector<8x32xf32>
    %c0_10 = arith.constant 0 : index
    %c0_11 = arith.constant 0 : index
    %54 = vector.load %arg4[%c0_10, %c0_11] : memref<32x32xf32, #tpu.memory_space<vmem>>, vector<32x32xf32>
    %cst_12 = arith.constant dense<0.000000e+00> : vector<8x32xf32>
    %55 = tpu.matmul %53, %54, %cst_12 {dimension_numbers = #tpu.dot_dimension_numbers<[1], [0], [0], [1], [0, 0, 1, 1], [], []>} : vector<8x32xf32>, vector<32x32xf32>, vector<8x32xf32> -> vector<8x32xf32>
    %c0_13 = arith.constant 0 : index
    %c0_14 = arith.constant 0 : index
    %56 = vector.load %arg5[%c0_13, %c0_14] : memref<1x32xf32, #tpu.memory_space<vmem>>, vector<1x32xf32>
    %57 = vector.broadcast %56 : vector<1x32xf32> to vector<8x32xf32>
    %58 = arith.addf %55, %57 : vector<8x32xf32>
    %59 = arith.addf %58, %1 : vector<8x32xf32>
    %cst_15 = arith.constant dense<0.000000e+00> : vector<8xf32>
    %60 = vector.multi_reduction <add>, %59, %cst_15 [1] : vector<8x32xf32> to vector<8xf32>
    %61 = vector.shape_cast %60 : vector<8xf32> to vector<8x1xf32>
    %cst_16 = arith.constant 3.200000e+01 : f32
    %62 = vector.broadcast %cst_16 : f32 to vector<8x1xf32>
    %63 = arith.divf %61, %62 : vector<8x1xf32>
    %64 = vector.broadcast %63 : vector<8x1xf32> to vector<8x32xf32>
    %65 = arith.subf %59, %64 : vector<8x32xf32>
    %66 = arith.mulf %65, %65 : vector<8x32xf32>
    %cst_17 = arith.constant dense<0.000000e+00> : vector<8xf32>
    %67 = vector.multi_reduction <add>, %66, %cst_17 [1] : vector<8x32xf32> to vector<8xf32>
    %68 = vector.shape_cast %67 : vector<8xf32> to vector<8x1xf32>
    %cst_18 = arith.constant 3.200000e+01 : f32
    %69 = vector.broadcast %cst_18 : f32 to vector<8x1xf32>
    %70 = arith.divf %68, %69 : vector<8x1xf32>
    %c0_19 = arith.constant 0 : index
    %c0_20 = arith.constant 0 : index
    %71 = vector.load %arg6[%c0_19, %c0_20] : memref<1x32xf32, #tpu.memory_space<vmem>>, vector<1x32xf32>
    %72 = vector.broadcast %63 : vector<8x1xf32> to vector<8x32xf32>
    %73 = arith.subf %59, %72 : vector<8x32xf32>
    %cst_21 = arith.constant 9.99999974E-6 : f32
    %74 = vector.broadcast %cst_21 : f32 to vector<8x1xf32>
    %75 = arith.addf %70, %74 : vector<8x1xf32>
    %76 = math.rsqrt %75 : vector<8x1xf32>
    %77 = vector.broadcast %76 : vector<8x1xf32> to vector<8x32xf32>
    %78 = arith.mulf %73, %77 : vector<8x32xf32>
    %79 = vector.broadcast %71 : vector<1x32xf32> to vector<8x32xf32>
    %80 = arith.mulf %79, %78 : vector<8x32xf32>
    %c0_22 = arith.constant 0 : index
    %c0_23 = arith.constant 0 : index
    %81 = vector.load %arg7[%c0_22, %c0_23] : memref<1x32xf32, #tpu.memory_space<vmem>>, vector<1x32xf32>
    %82 = vector.broadcast %81 : vector<1x32xf32> to vector<8x32xf32>
    %83 = arith.addf %80, %82 : vector<8x32xf32>
    %c0_24 = arith.constant 0 : index
    %c0_25 = arith.constant 0 : index
    %84 = vector.load %arg8[%c0_24, %c0_25] : memref<32x64xf32, #tpu.memory_space<vmem>>, vector<32x64xf32>
    %cst_26 = arith.constant dense<0.000000e+00> : vector<8x64xf32>
    %85 = tpu.matmul %83, %84, %cst_26 {dimension_numbers = #tpu.dot_dimension_numbers<[1], [0], [0], [1], [0, 0, 1, 1], [], []>} : vector<8x32xf32>, vector<32x64xf32>, vector<8x64xf32> -> vector<8x64xf32>
    %c0_27 = arith.constant 0 : index
    %c0_28 = arith.constant 0 : index
    %86 = vector.load %arg9[%c0_27, %c0_28] : memref<1x64xf32, #tpu.memory_space<vmem>>, vector<1x64xf32>
    %87 = vector.broadcast %86 : vector<1x64xf32> to vector<8x64xf32>
    %88 = arith.addf %85, %87 : vector<8x64xf32>
    %cst_29 = arith.constant 0.000000e+00 : f32
    %89 = vector.broadcast %cst_29 : f32 to vector<8x64xf32>
    %90 = arith.maximumf %88, %89 : vector<8x64xf32>
    %c0_30 = arith.constant 0 : index
    %c0_31 = arith.constant 0 : index
    %91 = vector.load %arg10[%c0_30, %c0_31] : memref<64x32xf32, #tpu.memory_space<vmem>>, vector<64x32xf32>
    %cst_32 = arith.constant dense<0.000000e+00> : vector<8x32xf32>
    %92 = tpu.matmul %90, %91, %cst_32 {dimension_numbers = #tpu.dot_dimension_numbers<[1], [0], [0], [1], [0, 0, 1, 1], [], []>} : vector<8x64xf32>, vector<64x32xf32>, vector<8x32xf32> -> vector<8x32xf32>
    %c0_33 = arith.constant 0 : index
    %c0_34 = arith.constant 0 : index
    %93 = vector.load %arg11[%c0_33, %c0_34] : memref<1x32xf32, #tpu.memory_space<vmem>>, vector<1x32xf32>
    %94 = vector.broadcast %93 : vector<1x32xf32> to vector<8x32xf32>
    %95 = arith.addf %92, %94 : vector<8x32xf32>
    %96 = arith.addf %95, %83 : vector<8x32xf32>
    %cst_35 = arith.constant dense<0.000000e+00> : vector<8xf32>
    %97 = vector.multi_reduction <add>, %96, %cst_35 [1] : vector<8x32xf32> to vector<8xf32>
    %98 = vector.shape_cast %97 : vector<8xf32> to vector<8x1xf32>
    %cst_36 = arith.constant 3.200000e+01 : f32
    %99 = vector.broadcast %cst_36 : f32 to vector<8x1xf32>
    %100 = arith.divf %98, %99 : vector<8x1xf32>
    %101 = vector.broadcast %100 : vector<8x1xf32> to vector<8x32xf32>
    %102 = arith.subf %96, %101 : vector<8x32xf32>
    %103 = arith.mulf %102, %102 : vector<8x32xf32>
    %cst_37 = arith.constant dense<0.000000e+00> : vector<8xf32>
    %104 = vector.multi_reduction <add>, %103, %cst_37 [1] : vector<8x32xf32> to vector<8xf32>
    %105 = vector.shape_cast %104 : vector<8xf32> to vector<8x1xf32>
    %cst_38 = arith.constant 3.200000e+01 : f32
    %106 = vector.broadcast %cst_38 : f32 to vector<8x1xf32>
    %107 = arith.divf %105, %106 : vector<8x1xf32>
    %c0_39 = arith.constant 0 : index
    %c0_40 = arith.constant 0 : index
    %108 = vector.load %arg12[%c0_39, %c0_40] : memref<1x32xf32, #tpu.memory_space<vmem>>, vector<1x32xf32>
    %109 = vector.broadcast %100 : vector<8x1xf32> to vector<8x32xf32>
    %110 = arith.subf %96, %109 : vector<8x32xf32>
    %cst_41 = arith.constant 9.99999974E-6 : f32
    %111 = vector.broadcast %cst_41 : f32 to vector<8x1xf32>
    %112 = arith.addf %107, %111 : vector<8x1xf32>
    %113 = math.rsqrt %112 : vector<8x1xf32>
    %114 = vector.broadcast %113 : vector<8x1xf32> to vector<8x32xf32>
    %115 = arith.mulf %110, %114 : vector<8x32xf32>
    %116 = vector.broadcast %108 : vector<1x32xf32> to vector<8x32xf32>
    %117 = arith.mulf %116, %115 : vector<8x32xf32>
    %c0_42 = arith.constant 0 : index
    %c0_43 = arith.constant 0 : index
    %118 = vector.load %arg13[%c0_42, %c0_43] : memref<1x32xf32, #tpu.memory_space<vmem>>, vector<1x32xf32>
    %119 = vector.broadcast %118 : vector<1x32xf32> to vector<8x32xf32>
    %120 = arith.addf %117, %119 : vector<8x32xf32>
    %121 = vector.shape_cast %120 : vector<8x32xf32> to vector<1x8x32xf32>
    %c0_44 = arith.constant 0 : index
    %c0_45 = arith.constant 0 : index
    %c0_46 = arith.constant 0 : index
    %122 = vector.load %arg14[%c0_44, %c0_45, %c0_46] : memref<1x8x32xf32, #tpu.memory_space<vmem>>, vector<1x8x32xf32>
    tpu.vector_store %arg14[%c0_44, %c0_45, %c0_46], %121 {strides = array<i32>} : memref<1x8x32xf32, #tpu.memory_space<vmem>>, vector<1x8x32xf32>,
    return
  }
  func.func @transform_0(%arg0: i32) -> (i32, i32, i32) {
    %c0_i32 = arith.constant 0 : i32
    %c0_i32_0 = arith.constant 0 : i32
    %c0_i32_1 = arith.constant 0 : i32
    return %arg0, %c0_i32, %c0_i32_0 : i32, i32, i32
  }
  func.func @transform_1(%arg0: i32) -> (i32, i32) {
    %c0_i32 = arith.constant 0 : i32
    %c0_i32_0 = arith.constant 0 : i32
    %c0_i32_1 = arith.constant 0 : i32
    return %c0_i32, %c0_i32_0 : i32, i32
  }
  func.func @transform_2(%arg0: i32) -> (i32, i32) {
    %c0_i32 = arith.constant 0 : i32
    %c0_i32_0 = arith.constant 0 : i32
    %c0_i32_1 = arith.constant 0 : i32
    return %c0_i32, %c0_i32_0 : i32, i32
  }
  func.func @transform_3(%arg0: i32) -> (i32, i32) {
    %c0_i32 = arith.constant 0 : i32
    %c0_i32_0 = arith.constant 0 : i32
    %c0_i32_1 = arith.constant 0 : i32
    return %c0_i32, %c0_i32_0 : i32, i32
  }
  func.func @transform_4(%arg0: i32) -> (i32, i32) {
    %c0_i32 = arith.constant 0 : i32
    %c0_i32_0 = arith.constant 0 : i32
    %c0_i32_1 = arith.constant 0 : i32
    return %c0_i32, %c0_i32_0 : i32, i32
  }
  func.func @transform_5(%arg0: i32) -> (i32, i32) {
    %c0_i32 = arith.constant 0 : i32
    %c0_i32_0 = arith.constant 0 : i32
    %c0_i32_1 = arith.constant 0 : i32
    return %c0_i32, %c0_i32_0 : i32, i32
  }
  func.func @transform_6(%arg0: i32) -> (i32, i32) {
    %c0_i32 = arith.constant 0 : i32
    %c0_i32_0 = arith.constant 0 : i32
    %c0_i32_1 = arith.constant 0 : i32
    return %c0_i32, %c0_i32_0 : i32, i32
  }
  func.func @transform_7(%arg0: i32) -> (i32, i32) {
    %c0_i32 = arith.constant 0 : i32
    %c0_i32_0 = arith.constant 0 : i32
    %c0_i32_1 = arith.constant 0 : i32
    return %c0_i32, %c0_i32_0 : i32, i32
  }
  func.func @transform_8(%arg0: i32) -> (i32, i32) {
    %c0_i32 = arith.constant 0 : i32
    %c0_i32_0 = arith.constant 0 : i32
    %c0_i32_1 = arith.constant 0 : i32
    return %c0_i32, %c0_i32_0 : i32, i32
  }
  func.func @transform_9(%arg0: i32) -> (i32, i32) {
    %c0_i32 = arith.constant 0 : i32
    %c0_i32_0 = arith.constant 0 : i32
    %c0_i32_1 = arith.constant 0 : i32
    return %c0_i32, %c0_i32_0 : i32, i32
  }
  func.func @transform_10(%arg0: i32) -> (i32, i32) {
    %c0_i32 = arith.constant 0 : i32
    %c0_i32_0 = arith.constant 0 : i32
    %c0_i32_1 = arith.constant 0 : i32
    return %c0_i32, %c0_i32_0 : i32, i32
  }
  func.func @transform_11(%arg0: i32) -> (i32, i32) {
    %c0_i32 = arith.constant 0 : i32
    %c0_i32_0 = arith.constant 0 : i32
    %c0_i32_1 = arith.constant 0 : i32
    return %c0_i32, %c0_i32_0 : i32, i32
  }
  func.func @transform_12(%arg0: i32) -> (i32, i32) {
    %c0_i32 = arith.constant 0 : i32
    %c0_i32_0 = arith.constant 0 : i32
    %c0_i32_1 = arith.constant 0 : i32
    return %c0_i32, %c0_i32_0 : i32, i32
  }
  func.func @transform_13(%arg0: i32) -> (i32, i32, i32) {
    %c0_i32 = arith.constant 0 : i32
    %c0_i32_0 = arith.constant 0 : i32
    %c0_i32_1 = arith.constant 0 : i32
    return %arg0, %c0_i32, %c0_i32_0 : i32, i32, i32
  }
}

module attributes {stable_mosaic.version = 11 : i64} {
  func.func @_encoder_layer_kernel(%arg0: i32, %arg1: memref<1x8x32xf32, #tpu.memory_space<vmem>>, %arg2: memref<32x96xf32, #tpu.memory_space<vmem>>, %arg3: memref<1x96xf32, #tpu.memory_space<vmem>>, %arg4: memref<32x32xf32, #tpu.memory_space<vmem>>, %arg5: memref<1x32xf32, #tpu.memory_space<vmem>>, %arg6: memref<1x32xf32, #tpu.memory_space<vmem>>, %arg7: memref<1x32xf32, #tpu.memory_space<vmem>>, %arg8: memref<32x64xf32, #tpu.memory_space<vmem>>, %arg9: memref<1x64xf32, #tpu.memory_space<vmem>>, %arg10: memref<64x32xf32, #tpu.memory_space<vmem>>, %arg11: memref<1x32xf32, #tpu.memory_space<vmem>>, %arg12: memref<1x32xf32, #tpu.memory_space<vmem>>, %arg13: memref<1x32xf32, #tpu.memory_space<vmem>>, %arg14: memref<1x8x32xf32, #tpu.memory_space<vmem>>) attributes {dimension_semantics = [#tpu.dimension_semantics<parallel>], iteration_bounds = array<i64: 2>, scalar_prefetch = 0 : i64, scratch_operands = 0 : i64, tpu.core_type = #tpu.core_type<tc>, window_params = [{transform_indices = @transform_0, window_bounds = array<i64: 1, 8, 32>}, {pipeline_mode = #tpu.pipeline_mode<synchronous>, transform_indices = @transform_1, window_bounds = array<i64: 32, 96>}, {pipeline_mode = #tpu.pipeline_mode<synchronous>, transform_indices = @transform_2, window_bounds = array<i64: 1, 96>}, {pipeline_mode = #tpu.pipeline_mode<synchronous>, transform_indices = @transform_3, window_bounds = array<i64: 32, 32>}, {pipeline_mode = #tpu.pipeline_mode<synchronous>, transform_indices = @transform_4, window_bounds = array<i64: 1, 32>}, {pipeline_mode = #tpu.pipeline_mode<synchronous>, transform_indices = @transform_5, window_bounds = array<i64: 1, 32>}, {pipeline_mode = #tpu.pipeline_mode<synchronous>, transform_indices = @transform_6, window_bounds = array<i64: 1, 32>}, {pipeline_mode = #tpu.pipeline_mode<synchronous>, transform_indices = @transform_7, window_bounds = array<i64: 32, 64>}, {pipeline_mode = #tpu.pipeline_mode<synchronous>, transform_indices = @transform_8, window_bounds = array<i64: 1, 64>}, {pipeline_mode = #tpu.pipeline_mode<synchronous>, transform_indices = @transform_9, window_bounds = array<i64: 64, 32>}, {pipeline_mode = #tpu.pipeline_mode<synchronous>, transform_indices = @transform_10, window_bounds = array<i64: 1, 32>}, {pipeline_mode = #tpu.pipeline_mode<synchronous>, transform_indices = @transform_11, window_bounds = array<i64: 1, 32>}, {pipeline_mode = #tpu.pipeline_mode<synchronous>, transform_indices = @transform_12, window_bounds = array<i64: 1, 32>}, {transform_indices = @transform_13, window_bounds = array<i64: 1, 8, 32>}]} {
    %c0 = arith.constant 0 : index
    %c0_0 = arith.constant 0 : index
    %c0_1 = arith.constant 0 : index
    %0 = vector.load %arg1[%c0, %c0_0, %c0_1] : memref<1x8x32xf32, #tpu.memory_space<vmem>>, vector<1x8x32xf32>
    %1 = vector.shape_cast %0 : vector<1x8x32xf32> to vector<8x32xf32>
    %c0_2 = arith.constant 0 : index
    %c0_3 = arith.constant 0 : index
    %2 = vector.load %arg2[%c0_2, %c0_3] : memref<32x96xf32, #tpu.memory_space<vmem>>, vector<32x96xf32>
    %cst = arith.constant dense<0.000000e+00> : vector<8x96xf32>
    %3 = tpu.matmul %1, %2, %cst {dimension_numbers = #tpu.dot_dimension_numbers<[1], [0], [0], [1], [0, 0, 1, 1], [], []>} : vector<8x32xf32>, vector<32x96xf32>, vector<8x96xf32> -> vector<8x96xf32>
    %c0_4 = arith.constant 0 : index
    %c0_5 = arith.constant 0 : index
    %4 = vector.load %arg3[%c0_4, %c0_5] : memref<1x96xf32, #tpu.memory_space<vmem>>, vector<1x96xf32>
    %5 = vector.broadcast %4 : vector<1x96xf32> to vector<8x96xf32>
    %6 = arith.addf %3, %5 : vector<8x96xf32>
    %7 = vector.extract_strided_slice %6 {offsets = [0, 0], sizes = [8, 8], strides = [1, 1]} : vector<8x96xf32> to vector<8x8xf32>
    %8 = vector.extract_strided_slice %6 {offsets = [0, 8], sizes = [8, 8], strides = [1, 1]} : vector<8x96xf32> to vector<8x8xf32>
    %9 = vector.extract_strided_slice %6 {offsets = [0, 16], sizes = [8, 8], strides = [1, 1]} : vector<8x96xf32> to vector<8x8xf32>
    %10 = vector.extract_strided_slice %6 {offsets = [0, 24], sizes = [8, 8], strides = [1, 1]} : vector<8x96xf32> to vector<8x8xf32>
    %11 = vector.shape_cast %7 : vector<8x8xf32> to vector<1x8x8xf32>
    %12 = vector.shape_cast %8 : vector<8x8xf32> to vector<1x8x8xf32>
    %13 = vector.shape_cast %9 : vector<8x8xf32> to vector<1x8x8xf32>
    %14 = vector.shape_cast %10 : vector<8x8xf32> to vector<1x8x8xf32>
    %15 = tpu.concatenate %11, %12, %13, %14 in 0 : vector<1x8x8xf32>, vector<1x8x8xf32>, vector<1x8x8xf32>, vector<1x8x8xf32> -> vector<4x8x8xf32>
    %16 = vector.extract_strided_slice %6 {offsets = [0, 32], sizes = [8, 8], strides = [1, 1]} : vector<8x96xf32> to vector<8x8xf32>
    %17 = vector.extract_strided_slice %6 {offsets = [0, 40], sizes = [8, 8], strides = [1, 1]} : vector<8x96xf32> to vector<8x8xf32>
    %18 = vector.extract_strided_slice %6 {offsets = [0, 48], sizes = [8, 8], strides = [1, 1]} : vector<8x96xf32> to vector<8x8xf32>
    %19 = vector.extract_strided_slice %6 {offsets = [0, 56], sizes = [8, 8], strides = [1, 1]} : vector<8x96xf32> to vector<8x8xf32>
    %20 = vector.shape_cast %16 : vector<8x8xf32> to vector<1x8x8xf32>
    %21 = vector.shape_cast %17 : vector<8x8xf32> to vector<1x8x8xf32>
    %22 = vector.shape_cast %18 : vector<8x8xf32> to vector<1x8x8xf32>
    %23 = vector.shape_cast %19 : vector<8x8xf32> to vector<1x8x8xf32>
    %24 = tpu.concatenate %20, %21, %22, %23 in 0 : vector<1x8x8xf32>, vector<1x8x8xf32>, vector<1x8x8xf32>, vector<1x8x8xf32> -> vector<4x8x8xf32>
    %25 = vector.extract_strided_slice %6 {offsets = [0, 64], sizes = [8, 8], strides = [1, 1]} : vector<8x96xf32> to vector<8x8xf32>
    %26 = vector.extract_strided_slice %6 {offsets = [0, 72], sizes = [8, 8], strides = [1, 1]} : vector<8x96xf32> to vector<8x8xf32>
    %27 = vector.extract_strided_slice %6 {offsets = [0, 80], sizes = [8, 8], strides = [1, 1]} : vector<8x96xf32> to vector<8x8xf32>
    %28 = vector.extract_strided_slice %6 {offsets = [0, 88], sizes = [8, 8], strides = [1, 1]} : vector<8x96xf32> to vector<8x8xf32>
    %29 = vector.shape_cast %25 : vector<8x8xf32> to vector<1x8x8xf32>
    %30 = vector.shape_cast %26 : vector<8x8xf32> to vector<1x8x8xf32>
    %31 = vector.shape_cast %27 : vector<8x8xf32> to vector<1x8x8xf32>
    %32 = vector.shape_cast %28 : vector<8x8xf32> to vector<1x8x8xf32>
    %33 = tpu.concatenate %29, %30, %31, %32 in 0 : vector<1x8x8xf32>, vector<1x8x8xf32>, vector<1x8x8xf32>, vector<1x8x8xf32> -> vector<4x8x8xf32>
    %cst_6 = arith.constant dense<0.000000e+00> : vector<4x8x8xf32>
    %34 = tpu.matmul %15, %24, %cst_6 {dimension_numbers = #tpu.dot_dimension_numbers<[2], [2], [1], [1], [0, 0, 0, 1, 1, 1], [0], [0]>} : vector<4x8x8xf32>, vector<4x8x8xf32>, vector<4x8x8xf32> -> vector<4x8x8xf32>
    %cst_7 = arith.constant dense<0xFF800000> : vector<4x8xf32>
    %35 = vector.multi_reduction <maximumf>, %34, %cst_7 [2] : vector<4x8x8xf32> to vector<4x8xf32>
    %36 = vector.shape_cast %35 : vector<4x8xf32> to vector<4x8x1xf32>
    %37 = vector.broadcast %36 : vector<4x8x1xf32> to vector<4x8x8xf32>
    %38 = arith.subf %34, %37 : vector<4x8x8xf32>
    %39 = math.exp %38 : vector<4x8x8xf32>
    %cst_8 = arith.constant dense<0.000000e+00> : vector<4x8xf32>
    %40 = vector.multi_reduction <add>, %39, %cst_8 [2] : vector<4x8x8xf32> to vector<4x8xf32>
    %41 = vector.shape_cast %40 : vector<4x8xf32> to vector<4x8x1xf32>
    %cst_9 = arith.constant dense<0.000000e+00> : vector<4x8x8xf32>
    %42 = tpu.matmul %39, %33, %cst_9 {dimension_numbers = #tpu.dot_dimension_numbers<[2], [1], [1], [2], [0, 0, 0, 1, 1, 2], [0], [0]>} : vector<4x8x8xf32>, vector<4x8x8xf32>, vector<4x8x8xf32> -> vector<4x8x8xf32>
    %43 = vector.broadcast %41 : vector<4x8x1xf32> to vector<4x8x8xf32>
    %44 = arith.divf %42, %43 : vector<4x8x8xf32>
    %45 = vector.extract_strided_slice %44 {offsets = [0, 0, 0], sizes = [1, 8, 8], strides = [1, 1, 1]} : vector<4x8x8xf32> to vector<1x8x8xf32>
    %46 = vector.shape_cast %45 : vector<1x8x8xf32> to vector<8x8xf32>
    %47 = vector.extract_strided_slice %44 {offsets = [1, 0, 0], sizes = [1, 8, 8], strides = [1, 1, 1]} : vector<4x8x8xf32> to vector<1x8x8xf32>
    %48 = vector.shape_cast %47 : vector<1x8x8xf32> to vector<8x8xf32>
    %49 = vector.extract_strided_slice %44 {offsets = [2, 0, 0], sizes = [1, 8, 8], strides = [1, 1, 1]} : vector<4x8x8xf32> to vector<1x8x8xf32>
    %50 = vector.shape_cast %49 : vector<1x8x8xf32> to vector<8x8xf32>
    %51 = vector.extract_strided_slice %44 {offsets = [3, 0, 0], sizes = [1, 8, 8], strides = [1, 1, 1]} : vector<4x8x8xf32> to vector<1x8x8xf32>
    %52 = vector.shape_cast %51 : vector<1x8x8xf32> to vector<8x8xf32>
    %53 = tpu.concatenate %46, %48, %50, %52 in 1 : vector<8x8xf32>, vector<8x8xf32>, vector<8x8xf32>, vector<8x8xf32> -> vector<8x32xf32>
    %c0_10 = arith.constant 0 : index
    %c0_11 = arith.constant 0 : index
    %54 = vector.load %arg4[%c0_10, %c0_11] : memref<32x32xf32, #tpu.memory_space<vmem>>, vector<32x32xf32>
    %cst_12 = arith.constant dense<0.000000e+00> : vector<8x32xf32>
    %55 = tpu.matmul %53, %54, %cst_12 {dimension_numbers = #tpu.dot_dimension_numbers<[1], [0], [0], [1], [0, 0, 1, 1], [], []>} : vector<8x32xf32>, vector<32x32xf32>, vector<8x32xf32> -> vector<8x32xf32>
    %c0_13 = arith.constant 0 : index
    %c0_14 = arith.constant 0 : index
    %56 = vector.load %arg5[%c0_13, %c0_14] : memref<1x32xf32, #tpu.memory_space<vmem>>, vector<1x32xf32>
    %57 = vector.broadcast %56 : vector<1x32xf32> to vector<8x32xf32>
    %58 = arith.addf %55, %57 : vector<8x32xf32>
    %59 = arith.addf %58, %1 : vector<8x32xf32>
    %cst_15 = arith.constant dense<0.000000e+00> : vector<8xf32>
    %60 = vector.multi_reduction <add>, %59, %cst_15 [1] : vector<8x32xf32> to vector<8xf32>
    %61 = vector.shape_cast %60 : vector<8xf32> to vector<8x1xf32>
    %cst_16 = arith.constant 3.200000e+01 : f32
    %62 = vector.broadcast %cst_16 : f32 to vector<8x1xf32>
    %63 = arith.divf %61, %62 : vector<8x1xf32>
    %64 = vector.broadcast %63 : vector<8x1xf32> to vector<8x32xf32>
    %65 = arith.subf %59, %64 : vector<8x32xf32>
    %66 = arith.mulf %65, %65 : vector<8x32xf32>
    %cst_17 = arith.constant dense<0.000000e+00> : vector<8xf32>
    %67 = vector.multi_reduction <add>, %66, %cst_17 [1] : vector<8x32xf32> to vector<8xf32>
    %68 = vector.shape_cast %67 : vector<8xf32> to vector<8x1xf32>
    %cst_18 = arith.constant 3.200000e+01 : f32
    %69 = vector.broadcast %cst_18 : f32 to vector<8x1xf32>
    %70 = arith.divf %68, %69 : vector<8x1xf32>
    %c0_19 = arith.constant 0 : index
    %c0_20 = arith.constant 0 : index
    %71 = vector.load %arg6[%c0_19, %c0_20] : memref<1x32xf32, #tpu.memory_space<vmem>>, vector<1x32xf32>
    %72 = vector.broadcast %63 : vector<8x1xf32> to vector<8x32xf32>
    %73 = arith.subf %59, %72 : vector<8x32xf32>
    %cst_21 = arith.constant 9.99999974E-6 : f32
    %74 = vector.broadcast %cst_21 : f32 to vector<8x1xf32>
    %75 = arith.addf %70, %74 : vector<8x1xf32>
    %76 = math.rsqrt %75 : vector<8x1xf32>
    %77 = vector.broadcast %76 : vector<8x1xf32> to vector<8x32xf32>
    %78 = arith.mulf %73, %77 : vector<8x32xf32>
    %79 = vector.broadcast %71 : vector<1x32xf32> to vector<8x32xf32>
    %80 = arith.mulf %79, %78 : vector<8x32xf32>
    %c0_22 = arith.constant 0 : index
    %c0_23 = arith.constant 0 : index
    %81 = vector.load %arg7[%c0_22, %c0_23] : memref<1x32xf32, #tpu.memory_space<vmem>>, vector<1x32xf32>
    %82 = vector.broadcast %81 : vector<1x32xf32> to vector<8x32xf32>
    %83 = arith.addf %80, %82 : vector<8x32xf32>
    %c0_24 = arith.constant 0 : index
    %c0_25 = arith.constant 0 : index
    %84 = vector.load %arg8[%c0_24, %c0_25] : memref<32x64xf32, #tpu.memory_space<vmem>>, vector<32x64xf32>
    %cst_26 = arith.constant dense<0.000000e+00> : vector<8x64xf32>
    %85 = tpu.matmul %83, %84, %cst_26 {dimension_numbers = #tpu.dot_dimension_numbers<[1], [0], [0], [1], [0, 0, 1, 1], [], []>} : vector<8x32xf32>, vector<32x64xf32>, vector<8x64xf32> -> vector<8x64xf32>
    %c0_27 = arith.constant 0 : index
    %c0_28 = arith.constant 0 : index
    %86 = vector.load %arg9[%c0_27, %c0_28] : memref<1x64xf32, #tpu.memory_space<vmem>>, vector<1x64xf32>
    %87 = vector.broadcast %86 : vector<1x64xf32> to vector<8x64xf32>
    %88 = arith.addf %85, %87 : vector<8x64xf32>
    %cst_29 = arith.constant 0.000000e+00 : f32
    %89 = vector.broadcast %cst_29 : f32 to vector<8x64xf32>
    %90 = arith.maximumf %88, %89 : vector<8x64xf32>
    %c0_30 = arith.constant 0 : index
    %c0_31 = arith.constant 0 : index
    %91 = vector.load %arg10[%c0_30, %c0_31] : memref<64x32xf32, #tpu.memory_space<vmem>>, vector<64x32xf32>
    %cst_32 = arith.constant dense<0.000000e+00> : vector<8x32xf32>
    %92 = tpu.matmul %90, %91, %cst_32 {dimension_numbers = #tpu.dot_dimension_numbers<[1], [0], [0], [1], [0, 0, 1, 1], [], []>} : vector<8x64xf32>, vector<64x32xf32>, vector<8x32xf32> -> vector<8x32xf32>
    %c0_33 = arith.constant 0 : index
    %c0_34 = arith.constant 0 : index
    %93 = vector.load %arg11[%c0_33, %c0_34] : memref<1x32xf32, #tpu.memory_space<vmem>>, vector<1x32xf32>
    %94 = vector.broadcast %93 : vector<1x32xf32> to vector<8x32xf32>
    %95 = arith.addf %92, %94 : vector<8x32xf32>
    %96 = arith.addf %95, %83 : vector<8x32xf32>
    %cst_35 = arith.constant dense<0.000000e+00> : vector<8xf32>
    %97 = vector.multi_reduction <add>, %96, %cst_35 [1] : vector<8x32xf32> to vector<8xf32>
    %98 = vector.shape_cast %97 : vector<8xf32> to vector<8x1xf32>
    %cst_36 = arith.constant 3.200000e+01 : f32
    %99 = vector.broadcast %cst_36 : f32 to vector<8x1xf32>
    %100 = arith.divf %98, %99 : vector<8x1xf32>
    %101 = vector.broadcast %100 : vector<8x1xf32> to vector<8x32xf32>
    %102 = arith.subf %96, %101 : vector<8x32xf32>
    %103 = arith.mulf %102, %102 : vector<8x32xf32>
    %cst_37 = arith.constant dense<0.000000e+00> : vector<8xf32>
    %104 = vector.multi_reduction <add>, %103, %cst_37 [1] : vector<8x32xf32> to vector<8xf32>
    %105 = vector.shape_cast %104 : vector<8xf32> to vector<8x1xf32>
    %cst_38 = arith.constant 3.200000e+01 : f32
    %106 = vector.broadcast %cst_38 : f32 to vector<8x1xf32>
    %107 = arith.divf %105, %106 : vector<8x1xf32>
    %c0_39 = arith.constant 0 : index
    %c0_40 = arith.constant 0 : index
    %108 = vector.load %arg12[%c0_39, %c0_40] : memref<1x32xf32, #tpu.memory_space<vmem>>, vector<1x32xf32>
    %109 = vector.broadcast %100 : vector<8x1xf32> to vector<8x32xf32>
    %110 = arith.subf %96, %109 : vector<8x32xf32>
    %cst_41 = arith.constant 9.99999974E-6 : f32
    %111 = vector.broadcast %cst_41 : f32 to vector<8x1xf32>
    %112 = arith.addf %107, %111 : vector<8x1xf32>
    %113 = math.rsqrt %112 : vector<8x1xf32>
    %114 = vector.broadcast %113 : vector<8x1xf32> to vector<8x32xf32>
    %115 = arith.mulf %110, %114 : vector<8x32xf32>
    %116 = vector.broadcast %108 : vector<1x32xf32> to vector<8x32xf32>
    %117 = arith.mulf %116, %115 : vector<8x32xf32>
    %c0_42 = arith.constant 0 : index
    %c0_43 = arith.constant 0 : index
    %118 = vector.load %arg13[%c0_42, %c0_43] : memref<1x32xf32, #tpu.memory_space<vmem>>, vector<1x32xf32>
    %119 = vector.broadcast %118 : vector<1x32xf32> to vector<8x32xf32>
    %120 = arith.addf %117, %119 : vector<8x32xf32>
    %121 = vector.shape_cast %120 : vector<8x32xf32> to vector<1x8x32xf32>
    %c0_44 = arith.constant 0 : index
    %c0_45 = arith.constant 0 : index
    %c0_46 = arith.constant 0 : index
    %122 = vector.load %arg14[%c0_44, %c0_45, %c0_46] : memref<1x8x32xf32, #tpu.memory_space<vmem>>, vector<1x8x32xf32>
    tpu.vector_store %arg14[%c0_44, %c0_45, %c0_46], %121 {strides = array<i32>} : memref<1x8x32xf32, #tpu.memory_space<vmem>>, vector<1x8x32xf32>,
    return
  }
  func.func @transform_0(%arg0: i32) -> (i32, i32, i32) {
    %c0_i32 = arith.constant 0 : i32
    %c0_i32_0 = arith.constant 0 : i32
    %c0_i32_1 = arith.constant 0 : i32
    return %arg0, %c0_i32, %c0_i32_0 : i32, i32, i32
  }
  func.func @transform_1(%arg0: i32) -> (i32, i32) {
    %c0_i32 = arith.constant 0 : i32
    %c0_i32_0 = arith.constant 0 : i32
    %c0_i32_1 = arith.constant 0 : i32
    return %c0_i32, %c0_i32_0 : i32, i32
  }
  func.func @transform_2(%arg0: i32) -> (i32, i32) {
    %c0_i32 = arith.constant 0 : i32
    %c0_i32_0 = arith.constant 0 : i32
    %c0_i32_1 = arith.constant 0 : i32
    return %c0_i32, %c0_i32_0 : i32, i32
  }
  func.func @transform_3(%arg0: i32) -> (i32, i32) {
    %c0_i32 = arith.constant 0 : i32
    %c0_i32_0 = arith.constant 0 : i32
    %c0_i32_1 = arith.constant 0 : i32
    return %c0_i32, %c0_i32_0 : i32, i32
  }
  func.func @transform_4(%arg0: i32) -> (i32, i32) {
    %c0_i32 = arith.constant 0 : i32
    %c0_i32_0 = arith.constant 0 : i32
    %c0_i32_1 = arith.constant 0 : i32
    return %c0_i32, %c0_i32_0 : i32, i32
  }
  func.func @transform_5(%arg0: i32) -> (i32, i32) {
    %c0_i32 = arith.constant 0 : i32
    %c0_i32_0 = arith.constant 0 : i32
    %c0_i32_1 = arith.constant 0 : i32
    return %c0_i32, %c0_i32_0 : i32, i32
  }
  func.func @transform_6(%arg0: i32) -> (i32, i32) {
    %c0_i32 = arith.constant 0 : i32
    %c0_i32_0 = arith.constant 0 : i32
    %c0_i32_1 = arith.constant 0 : i32
    return %c0_i32, %c0_i32_0 : i32, i32
  }
  func.func @transform_7(%arg0: i32) -> (i32, i32) {
    %c0_i32 = arith.constant 0 : i32
    %c0_i32_0 = arith.constant 0 : i32
    %c0_i32_1 = arith.constant 0 : i32
    return %c0_i32, %c0_i32_0 : i32, i32
  }
  func.func @transform_8(%arg0: i32) -> (i32, i32) {
    %c0_i32 = arith.constant 0 : i32
    %c0_i32_0 = arith.constant 0 : i32
    %c0_i32_1 = arith.constant 0 : i32
    return %c0_i32, %c0_i32_0 : i32, i32
  }
  func.func @transform_9(%arg0: i32) -> (i32, i32) {
    %c0_i32 = arith.constant 0 : i32
    %c0_i32_0 = arith.constant 0 : i32
    %c0_i32_1 = arith.constant 0 : i32
    return %c0_i32, %c0_i32_0 : i32, i32
  }
  func.func @transform_10(%arg0: i32) -> (i32, i32) {
    %c0_i32 = arith.constant 0 : i32
    %c0_i32_0 = arith.constant 0 : i32
    %c0_i32_1 = arith.constant 0 : i32
    return %c0_i32, %c0_i32_0 : i32, i32
  }
  func.func @transform_11(%arg0: i32) -> (i32, i32) {
    %c0_i32 = arith.constant 0 : i32
    %c0_i32_0 = arith.constant 0 : i32
    %c0_i32_1 = arith.constant 0 : i32
    return %c0_i32, %c0_i32_0 : i32, i32
  }
  func.func @transform_12(%arg0: i32) -> (i32, i32) {
    %c0_i32 = arith.constant 0 : i32
    %c0_i32_0 = arith.constant 0 : i32
    %c0_i32_1 = arith.constant 0 : i32
    return %c0_i32, %c0_i32_0 : i32, i32
  }
  func.func @transform_13(%arg0: i32) -> (i32, i32, i32) {
    %c0_i32 = arith.constant 0 : i32
    %c0_i32_0 = arith.constant 0 : i32
    %c0_i32_1 = arith.constant 0 : i32
    return %arg0, %c0_i32, %c0_i32_0 : i32, i32, i32
  }
}

</mosaic_0001>

<bundles_post_ra>
// kernel: tpu_custom_call.1
= control target key start
LH: loop header
LB: loop body
LE: loop exit
PB: predicated region body
PF: predicated region fallthrough
CT: control target
= control target key end

     0   :  { %s2361_s0 = inlined_call_operand.hbm [shape: f32[2,8,32], index: 0, kind: input, shape index: {}]   ;;  %s2362_s1 = inlined_call_operand.vmem [shape: f32[32,96], index: 1, kind: input, shape index: {}]   ;;  %s2363_s2 = inlined_call_operand.vmem [shape: f32[1,96], index: 2, kind: input, shape index: {}]   ;;  %s2364_s3 = inlined_call_operand.vmem [shape: f32[32,32], index: 3, kind: input, shape index: {}]   ;;  %s2365_s4 = inlined_call_operand.vmem [shape: f32[1,32], index: 4, kind: input, shape index: {}]   ;;  %s2366_s5 = inlined_call_operand.vmem [shape: f32[1,32], index: 5, kind: input, shape index: {}]   ;;  %s2367_s6 = inlined_call_operand.vmem [shape: f32[1,32], index: 6, kind: input, shape index: {}]   ;;  %s2368_s7 = inlined_call_operand.vmem [shape: f32[32,64], index: 7, kind: input, shape index: {}]   ;;  %s2369_s8 = inlined_call_operand.vmem [shape: f32[1,64], index: 8, kind: input, shape index: {}]   ;;  %s2370_s9 = inlined_call_operand.vmem [shape: f32[64,32], index: 9, kind: input, shape index: {}]   ;;  %s2371_s10 = inlined_call_operand.vmem [shape: f32[1,32], index: 10, kind: input, shape index: {}]   ;;  %s2372_s11 = inlined_call_operand.vmem [shape: f32[1,32], index: 11, kind: input, shape index: {}]   ;;  %s2373_s12 = inlined_call_operand.vmem [shape: f32[1,32], index: 12, kind: input, shape index: {}]   ;;  %s2374_s13 = inlined_call_operand.hbm [shape: f32[2,8,32], index: 13, kind: output, shape index: {}]  }
   0x1   :  { %2383 = sst [smem:[#allocation13_spill]] %s2374_s13 }
   0x2   :  { %18 = vsyncpa [#allocation3], 0 }
   0x3   :  { %20 = vsyncpa [#allocation3 + $0x1], 0 }
   0x4   :  { %21 = vsyncpa [#allocation4], 0 }
   0x5   :  { %23 = vsyncpa [#allocation4 + $0x1], 0  ;;  %s2043_s25 = smov 0   ;;  %s2045_s26 = smov 0  }
   0x6   :  { %s2047_s27 = smov 0   ;;  %s2049_s28 = smov 0  }
   0x7 LB: > { %2384 = sst [smem:[#allocation8_spill]] %s1947_s25  ;;  %s2064_s29 = sadd.s32 4294967295, %s1959_s28   ;;  %s1959_s28 = sphi %s2049_s28, %s2403_s28   ;;  %s1955_s27 = sphi %s2047_s27, %s2405_s27   ;;  %s1951_s26 = sphi %s2045_s26, %s2407_s26   ;;  %s1947_s25 = sphi %s2043_s25, %s2406_s25  }
   0x8   : > { %2385 = sst [smem:[#allocation9_spill]] %s1955_s27  ;;  %s1623_s30 = sadd.s32 4294967294, %s1959_s28  }
   0x9   : > { %s2068_s14 = sadd.s32 1, %s1959_s28   ;;  %s36_s15 = sadd.s32 1, %s1955_s27 }
   0xa   : > { %2386 = sst [smem:[#allocation10_spill]] %s2068_s14  ;;  %s33_s16 = ssub.s32 %s1959_s28, %s2068_s14 }
   0xb   : > { %p43_p0 = scmp.ne.s32.totalorder %s1955_s27, %s1951_s26  ;;  %p34_p1 = scmp.eq.s32.totalorder %s33_s16, 0 }
   0xc   : > { %p44_p2 = scmp.eq.s32.totalorder %s1959_s28, 0  ;;  %p49_p3 = scmp.ne.s32.totalorder %s1951_s26, %s1947_s25 }
   0xd   : > { %p50_p4 = scmp.eq.s32.totalorder %s2064_s29, 0  ;;  %p325_p7 = scmp.eq.s32.totalorder %s2064_s29, 1 }
   0xe   : > { %s2080_s17 = scalar_select %p34_p1, %s1955_s27, %s36_s15  }
   0xf   : > { %p2082_p5 = por %p44_p2, %p43_p0  ;;  %p2086_p6 = por %p50_p4, %p49_p3 }
  0x10   : > { %2387 = sst [smem:[#allocation11_spill]] %s2080_s17  ;;  %p331_p8 = scmp.eq.s32.totalorder %s1623_s30, 1 }
  0x11   : > { %s2389_s19 = scalar_select %p2086_p6, 1, 0 }
  0x12   : > { %p1803_p10 = scmp.lt.s32.totalorder %s1959_s28, 2  ;;  %p2093_p11 = por %p325_p7, %p43_p0 }
  0x13   : > { %p2097_p12 = por %p331_p8, %p49_p3  ;;  %s387_s22 = sand.u32 1, %s1955_s27  }
  0x14   : > { %s2390_s20 = scalar_select %p2093_p11, 1, 0 }
  0x15   : > { %s2391_s21 = scalar_select %p2097_p12, 1, 0 }
  0x16   : > { %s1627_s23 = sshll.u32 %s1959_s28, 7  ;;  %s1626_s24 = sshll.u32 %s387_s22, 3 }
  0x17   : > { %2392 = sst [smem:[#allocation12_spill]] %s2391_s21  ;;  %s2106_s17 = scalar_lea.hbm %s2361_s0, %s1627_s23 }
  0x18   : > { %s391_s30 = scalar_lea.vmem [#allocation2], %s1626_s24  ;;  %p2110_p13 = pnand %p1803_p10, %p2082_p5 }
  0x19   : > { %s398_s14 = sshll.u32 %s391_s30, 4  ;;  %s388_s27 = scalar_lea.sflag [#allocation3], %s387_s22  ;;  %s2114_s14 = int_to_ptr.vmem [resolvable:$true] %s398_s14 }
  0x1a   : > { %s1867_s21 = scalar_lea.hbm %s2106_s17, 128  ;;  %p1869_p3 = pneg %p2110_p13 }
  0x1b   : > { %p1868_p2 = scmp.ne.s32.totalorder %s2106_s17, %s1867_s21  ;;  %s1872_s18 = scalar_lea.hbm %s2361_s0, 256 }
  0x1c   : > { %p1873_p5 = scmp.lt.s32.totalorder %s2106_s17, %s2361_s0  ;;  %p1874_p8 = scmp.lt.s32.totalorder %s1872_s18, %s1867_s21 }
  0x1d   : > { %p1870_p4 = pnand %p1869_p3, %p1868_p2 }
  0x1e   : > { %p1875_p10 = por %p1874_p8, %p1873_p5 }
  0x1f   : > { %p1871_p7 = pneg %p1870_p4 }
  0x21   : > { %p1876_p9 = pnand %p1875_p10, %p1871_p7 }
  0x23   : > { %1879 = shalt.err (!%p1876_p9)
}
  0x24   : > { %s1880_s22 = scalar_lea.vmem %s2114_s14, 128  ;;  %s1961_s30 = smov [#allocation2]  }
  0x25   : > { %p1881_p0 = scmp.ne.s32.totalorder %s2114_s14, %s1880_s22  ;;  %s1885_s13 = sshll.u32 %s1961_s30, 4  ;;  %s1886_s13 = int_to_ptr.vmem [resolvable:$false] %s1885_s13 }
  0x26   : > { %s1887_s23 = scalar_lea.vmem %s1886_s13, 256  ;;  %p1888_p4 = scmp.lt.s32.totalorder %s2114_s14, %s1886_s13 }
  0x27   : > { %p1883_p1 = pnand %p1881_p0, %p1869_p3  ;;  %p1889_p12 = scmp.lt.s32.totalorder %s1887_s23, %s1880_s22 }
  0x29   : > { %p1884_p2 = pneg %p1883_p1  ;;  %p1890_p11 = por %p1889_p12, %p1888_p4 }
  0x2b   : > { %p1891_p6 = pnand %p1890_p11, %p1884_p2 }
  0x2d   : > { %1894 = shalt.err (!%p1891_p6)
}
  0x2e   : > { %1798 = dma.hbm_to_vmem [thread:$0]  (!%p2110_p13), %s2106_s17, 128, %s2114_s14, %s388_s27  }
  0x2f   : > { %p2394_p9 = scmp.lt.s32.totalorder %s1959_s28, 3  ;;  %p2395_p7 = scmp.ge.s32.totalorder %s1959_s28, 1 }
  0x31   : > { %p404_p0 = pnand %p2395_p7, %p2394_p9 }
  0x32   : > { %s2141_s21 = sand.u32 (!%p404_p0), 1, %s1951_s26   ;;  %p2396_p6 = scmp.ne.s32.totalorder (!%p404_p0), %s2389_s19, 0 }
  0x33   : > { %407 = sbr.rel (%p404_p0) target bundleno = 2385 (0x951), region = 72  ;;  %s1629_s13 = sshll.u32 (!%p404_p0), %s2141_s21, 3 }
  0x34   : > { %s410_s24 = scalar_lea.sflag (!%p404_p0), [#allocation3], %s2141_s21  ;;  %s413_s25 = scalar_lea.vmem (!%p404_p0), [#allocation2], %s1629_s13 }
  0x38   : > { %1938 = dma.done.wait (%p2396_p6), %s410_s24, 128  }
  0x39   : > { %1940 = vsyncadd (%p2396_p6), %s410_s24, 4294967168  ;;  %v1962_v0 = vmov 0.0   ;;  %vm1963_vm0 = vmmov 0   ;;  %v460_v1 = vld [vmem:[%s2362_s1 + $0x18] sm:$0xff]  ;;  %v459_v2 = vld [vmem:[%s2362_s1 + $0x10] sm:$0xff]  ;;  %vm468_vm1 = vcmask 261120  }
  0x3a   : > { %1699 = vmatprep.subr.mxu1 %v1962_v0  ;;  %1707 = vmatprep.mubr.msk.f32.mxu1 %vm1963_vm0, %v1962_v0  ;;  %v458_v3 = vld [vmem:[%s2362_s1 + $0x8] sm:$0xff]  ;;  %v457_v4 = vld [vmem:[%s2362_s1] sm:$0xff]  ;;  %s1964_s24 = smov 104   ;;  %s1966_s27 = smov 96   ;;  %vm551_vm2 = vcmask 64512   ;;  %v1222_v57 = vld [vmem:[%s2364_s3 + $0x18] sm:$0xff] }
  0x3b   : > { %1720 = vmatprep.subr.mxu0 %v1962_v0  ;;  %1722 = vmatprep.mubr.msk.f32.mxu0 %vm1963_vm0, %v1962_v0  ;;  %v2171_v5 = vld [vmem:[%s413_s25] sm:$0xff]  ;;  %s1965_s25 = smov 120   ;;  %s1967_s14 = smov 112   ;;  %v1221_v59 = vld [vmem:[%s2364_s3 + $0x10] sm:$0xff]  ;;  %vm1215_vm3 = vcmask 130048   ;;  %vm1217_vm4 = vcmask 195584  }
  0x3c   : > { %1700 = vmatpush3.msra.mxu1 %v460_v1  ;;  %v1631_v6 = vld [vmem:[%s2363_s2] ss:$0 sm:$0xff]  ;;  %s1968_s17 = smov 64   ;;  %v1220_v60 = vld [vmem:[%s2364_s3 + $0x8] sm:$0xff]  ;;  %vm1434_vm5 = vcmask 523264   ;;  %s1656_s19 = sshll.u32 %s2064_s29, 7 }
  0x3d   : > { %1701 = vmatprep.subr.mxu1 %v1962_v0  ;;  %v1219_v61 = vld [vmem:[%s2364_s3] sm:$0xff]  ;;  %s455_s15 = scalar_lea.vmem [#allocation5], %s1629_s13  ;;  %s2397_s23 = sld [smem:[#allocation13_spill]] }
  0x3e   : > { %1702 = vmatpush3.msra.mxu1 %v459_v2  ;;  %s1553_s16 = sshll.u32 %s455_s15, 4  ;;  %p2398_p12 = scmp.ne.s32.totalorder %s2390_s20, 0  ;;  %s1554_s16 = int_to_ptr.vmem [resolvable:$true] %s1553_s16 }
  0x3f   : > { %1703 = vmatprep.subr.mxu1 %v1962_v0 }
  0x40   : > { %1704 = vmatpush3.msra.mxu1 %v458_v3 }
  0x41   : > { %1705 = vmatprep.subr.mxu1 %v1962_v0 }
  0x42   : > { %1706 = vmatpush3.msra.mxu1 %v457_v4 }
  0x43   : > { %1708 = vmatmul.mubr.msk.f32.vlgmr.msra.gmra.mxu1 %vm468_vm1, %v2171_v5  ;;  %1710 = vmatprep.subr.mxu1 %v1962_v0 }
  0x44   : > { %1712 = vmatprep.mubr.msk.f32.mxu1 %vm1963_vm0, %v1962_v0 }
 0x103   : > { %v538_v7 = vpop.f32.mrf.mxu1 }
 0x104   : > { %v539_v8 = vadd.f32 %v1631_v6, %v538_v7 }
 0x105   : > { %v1709_v9 = vpop.f32.mrf.mxu1 }
 0x106   : > { %547 = vrot.lane.b32.xlu1 %v539_v8, %s1964_s24  ;;  %543 = vrot.lane.b32.xlu0 %v539_v8, %s1965_s25  ;;  %s1969_s25 = smov 8   ;;  %s1551_s24 = scalar_lea.hbm %s2397_s23, %s1656_s19 }
 0x10a   : > { %549 = vrot.lane.b32.xlu1 %v539_v8, %s1966_s27  ;;  %545 = vrot.lane.b32.xlu0 %v539_v8, %s1967_s14  ;;  %s1971_s14 = smov 24  }
 0x178   : > { %v548_v10 = vpop.permute.xlu1 %547  ;;  %v544_v11 = vpop.permute.xlu0 %543 }
 0x179   : > { %626 = vrot.lane.b32.xlu0 %v544_v11, %s1966_s27 }
 0x17c   : > { %v550_v12 = vpop.permute.xlu1 %549  ;;  %v546_v13 = vpop.permute.xlu0 %545 }
 0x17d   : > { %1711 = vmatpush3.xpose.msk.msra.mxu1 %vm551_vm2, %v550_v12  ;;  %778 = vrot.lane.b32.xlu0 %v548_v10, %s1966_s27 }
 0x17e   : > { %702 = vrot.lane.b32.xlu1 %v546_v13, %s1966_s27  ;;  %1715 = vmatprep.subr.mxu1 %v1962_v0  ;;  %s1970_s27 = smov 16  }
 0x180   : > { %1713 = vmatmul.mubr.msk.f32.vlgmr.msra.gmra.mxu1 %vm551_vm2, %v539_v8 }
 0x181   : > { %890 = vrot.lane.b32.xlu0 %v539_v8, %s1968_s17  ;;  %1717 = vmatprep.mubr.msk.f32.mxu1 %vm1963_vm0, %v1962_v0 }
 0x182   : > { %966 = vrot.lane.b32.xlu1 %v544_v11, %s1968_s17 }
 0x1eb   : > { %v627_v14 = vpop.permute.xlu0 %626 }
 0x1ec   : > { %1716 = vmatpush3.xpose.msk.msra.mxu1 %vm551_vm2, %v627_v14 }
 0x1ed   : > { %1725 = vmatprep.subr.mxu1 %v1962_v0 }
 0x1ef   : > { %1718 = vmatmul.mubr.msk.f32.vlgmr.msra.gmra.mxu1 %vm551_vm2, %v544_v11  ;;  %v779_v15 = vpop.permute.xlu0 %778 }
 0x1f0   : > { %v703_v16 = vpop.permute.xlu1 %702  ;;  %1726 = vmatpush3.xpose.msk.msra.mxu1 %vm551_vm2, %v779_v15  ;;  %1727 = vmatprep.mubr.msk.f32.mxu1 %vm1963_vm0, %v1962_v0 }
 0x1f1   : > { %1721 = vmatpush3.xpose.msk.msra.mxu0 %vm551_vm2, %v703_v16  ;;  %1735 = vmatprep.subr.mxu1 %v1962_v0 }
 0x1f2   : > { %1730 = vmatprep.subr.mxu0 %v1962_v0 }
 0x1f3   : > { %1728 = vmatmul.mubr.msk.f32.vlgmr.msra.gmra.mxu1 %vm551_vm2, %v548_v10  ;;  %v891_v17 = vpop.permute.xlu0 %890 }
 0x1f4   : > { %1723 = vmatmul.mubr.msk.f32.vlgmr.msra.gmra.mxu0 %vm551_vm2, %v546_v13  ;;  %v967_v18 = vpop.permute.xlu1 %966  ;;  %1737 = vmatprep.mubr.msk.f32.mxu1 %vm1963_vm0, %v1962_v0 }
 0x1f5   : > { %1731 = vmatpush3.msra.mxu0 %v891_v17  ;;  %1736 = vmatpush3.msra.mxu1 %v967_v18 }
 0x1f6   : > { %1732 = vmatprep.mubr.msk.f32.mxu0 %vm1963_vm0, %v1962_v0  ;;  %1740 = vmatprep.subr.mxu0 %v1962_v0 }
 0x1f7   : > { %1745 = vmatprep.subr.mxu1 %v1962_v0 }
 0x240   : > { %v622_v19 = vpop.f32.mrf.mxu1 }
 0x241   : > { %v854_v20 = vsel %vm551_vm2, %v622_v19, -inf }
 0x242   : > { %855 = vmax.xlane.f32.xlu1 %v854_v20  ;;  %v1714_v21 = vpop.f32.mrf.mxu1 }
 0x243   : > { %v1645_v21 = vld [vmem:[%s2365_s4] ss:$0 sm:$0xff] }
 0x2af   : > { %v698_v22 = vpop.f32.mrf.mxu1 }
 0x2b0   : > { %v857_v23 = vsel %vm551_vm2, %v698_v22, -inf }
 0x2b1   : > { %858 = vmax.xlane.f32.xlu0 %v857_v23  ;;  %v1719_v24 = vpop.f32.mrf.mxu1 }
 0x2b3   : > { %v850_v25 = vpop.f32.mrf.mxu1 }
 0x2b4   : > { %v774_v26 = vpop.f32.mrf.mxu0  ;;  %v863_v27 = vsel %vm551_vm2, %v850_v25, -inf }
 0x2b5   : > { %v860_v28 = vsel %vm551_vm2, %v774_v26, -inf  ;;  %864 = vmax.xlane.f32.xlu1 %v863_v27  ;;  %v1729_v29 = vpop.f32.mrf.mxu1 }
 0x2b6   : > { %v1724_v30 = vpop.f32.mrf.mxu0  ;;  %861 = vmax.xlane.f32.xlu0 %v860_v28 }
 0x2c6   : > { %1042 = vrot.lane.b32.xlu1 %v546_v13, %s1968_s17 }
 0x2cb   : > { %v856_v31 = vpop.xlane.xlu1 %855 }
 0x2cc   : > { %v866_v32 = vsub.f32 %v622_v19, %v856_v31  ;;  %1118 = vrot.lane.b32.xlu0 %v548_v10, %s1968_s17 }
 0x2ce   : > { %v870_v33 = vmul.f32 1.442695, %v866_v32  ;;  %v1337_v32 = vld [vmem:[%s2368_s7 + $0x18] sm:$0xff] }
 0x2d0   : > { %1847 = vpow2.f32 %v870_v33  ;;  %v1335_v33 = vld [vmem:[%s2368_s7 + $0x8] sm:$0xff] }
 0x2dd   : > { %v1848_v34 = vpop.eup %1847 }
 0x2de   : > { %1733 = vmatmul.mubr.msk.f32.vlgmr.msra.gmra.mxu0 %vm551_vm2, %v1848_v34  ;;  %v878_v50 = vsel %vm551_vm2, %v1848_v34, 0.0  ;;  %v1334_v34 = vld [vmem:[%s2368_s7] sm:$0xff] }
 0x2df   : > { %1742 = vmatprep.mubr.msk.f32.mxu0 %vm1963_vm0, %v1962_v0 }
 0x33a   : > { %v859_v35 = vpop.xlane.xlu0 %858 }
 0x33b   : > { %v867_v36 = vsub.f32 %v698_v22, %v859_v35  ;;  %v1426_v35 = vld [vmem:[%s2370_s9 + $0x38] sm:$0xff] }
 0x33d   : > { %v872_v37 = vmul.f32 1.442695, %v867_v36  ;;  %v1425_v36 = vld [vmem:[%s2370_s9 + $0x30] sm:$0xff] }
 0x33e   : > { %v865_v38 = vpop.xlane.xlu1 %864 }
 0x33f   : > { %1849 = vpow2.f32 %v872_v37  ;;  %v862_v39 = vpop.xlane.xlu0 %861  ;;  %v869_v40 = vsub.f32 %v850_v25, %v865_v38  ;;  %v1424_v37 = vld [vmem:[%s2370_s9 + $0x28] sm:$0xff]  ;;  %v1423_v38 = vld [vmem:[%s2370_s9 + $0x20] sm:$0xff] }
 0x340   : > { %v868_v41 = vsub.f32 %v774_v26, %v862_v39  ;;  %v1422_v39 = vld [vmem:[%s2370_s9 + $0x18] sm:$0xff] }
 0x341   : > { %v876_v42 = vmul.f32 1.442695, %v869_v40 }
 0x342   : > { %v874_v43 = vmul.f32 1.442695, %v868_v41  ;;  %v1043_v44 = vpop.permute.xlu1 %1042 }
 0x343   : > { %1851 = vpow2.f32 %v876_v42  ;;  %1741 = vmatpush3.msra.mxu0 %v1043_v44  ;;  %v1119_v46 = vpop.permute.xlu0 %1118  ;;  %v1647_v44 = vld [vmem:[%s2366_s5] ss:$0 sm:$0xff] }
 0x344   : > { %1853 = vpow2.f32 %v874_v43  ;;  %1750 = vmatprep.subr.mxu0 %v1962_v0 }
 0x34c   : > { %v1850_v45 = vpop.eup %1849 }
 0x34d   : > { %1738 = vmatmul.mubr.msk.f32.vlgmr.msra.gmra.mxu1 %vm551_vm2, %v1850_v45  ;;  %v881_v47 = vsel %vm551_vm2, %v1850_v45, 0.0 }
 0x34e   : > { %1746 = vmatpush3.msra.mxu1 %v1119_v46  ;;  %882 = vadd.xlane.f32.xlu1 %v881_v47  ;;  %v1648_v46 = vld [vmem:[%s2367_s6] ss:$0 sm:$0xff] }
 0x34f   : > { %1747 = vmatprep.mubr.msk.f32.mxu1 %vm1963_vm0, %v1962_v0  ;;  %1761 = vmatprep.subr.mxu1 %v1962_v0 }
 0x350   : > { %v1852_v48 = vpop.eup %1851 }
 0x351   : > { %v1854_v49 = vpop.eup %1853  ;;  %1748 = vmatmul.mubr.msk.f32.vlgmr.msra.gmra.mxu1 %vm551_vm2, %v1852_v48  ;;  %v887_v52 = vsel %vm551_vm2, %v1852_v48, 0.0 }
 0x352   : > { %1743 = vmatmul.mubr.msk.f32.vlgmr.msra.gmra.mxu0 %vm551_vm2, %v1854_v49  ;;  %v884_v51 = vsel %vm551_vm2, %v1854_v49, 0.0  ;;  %879 = vadd.xlane.f32.xlu1 %v878_v50  ;;  %v1421_v49 = vld [vmem:[%s2370_s9 + $0x10] sm:$0xff]  ;;  %v1420_v50 = vld [vmem:[%s2370_s9 + $0x8] sm:$0xff] }
 0x353   : > { %885 = vadd.xlane.f32.xlu0 %v884_v51  ;;  %1758 = vmatprep.mubr.msk.f32.mxu0 %vm1963_vm0, %v1962_v0  ;;  %v1419_v51 = vld [vmem:[%s2370_s9] sm:$0xff] }
 0x354   : > { %1769 = vmatprep.mubr.msk.f32.mxu1 %vm1963_vm0, %v1962_v0  ;;  %1751 = vmatpush3.msra.mxu0 %v1222_v57  ;;  %v1651_v57 = vld [vmem:[%s2371_s10] ss:$0 sm:$0xff] }
 0x355   : > { %1752 = vmatprep.subr.mxu0 %v1962_v0  ;;  %1762 = vmatpush3.msra.mxu1 %v1337_v32 }
 0x356   : > { %1753 = vmatpush3.msra.mxu0 %v1221_v59  ;;  %1763 = vmatprep.subr.mxu1 %v1962_v0 }
 0x357   : > { %888 = vadd.xlane.f32.xlu0 %v887_v52  ;;  %1754 = vmatprep.subr.mxu0 %v1962_v0  ;;  %v1649_v52 = vld [vmem:[%s2369_s8] ss:$0 sm:$0xff] }
 0x358   : > { %1755 = vmatpush3.msra.mxu0 %v1220_v60 }
 0x359   : > { %1756 = vmatprep.subr.mxu0 %v1962_v0 }
 0x35a   : > { %1757 = vmatpush3.msra.mxu0 %v1219_v61 }
 0x35b   : > { %1772 = vmatprep.subr.mxu0 %v1962_v0 }
 0x39e   : > { %v962_v53 = vpop.f32.mrf.mxu0 }
 0x3a0   : > { %v1734_v54 = vpop.f32.mrf.mxu0 }
 0x3d7   : > { %v883_v55 = vpop.xlane.xlu1 %882 }
 0x3d8   : > { %1855 = vrcp.f32 %v883_v55 }
 0x3db   : > { %v880_v12 = vpop.xlane.xlu1 %879 }
 0x3dc   : > { %v886_v56 = vpop.xlane.xlu0 %885 }
 0x3dd   : > { %1857 = vrcp.f32 %v886_v56 }
 0x3e0   : > { %v889_v58 = vpop.xlane.xlu0 %888 }
 0x3e1   : > { %1859 = vrcp.f32 %v889_v58 }
 0x3e2   : > { %1861 = vrcp.f32 %v880_v12 }
 0x3e5   : > { %v1856_v62 = vpop.eup %1855 }
 0x3ea   : > { %v1858_v4 = vpop.eup %1857 }
 0x3ee   : > { %v1860_v10 = vpop.eup %1859 }
 0x3ef   : > { %v1862_v13 = vpop.eup %1861 }
 0x3f0   : > { %v1195_v16 = vmul.f32 %v1862_v13, %v962_v53 }
 0x40d   : > { %v1038_v63 = vpop.f32.mrf.mxu1 }
 0x40e   : > { %v1197_v1 = vmul.f32 %v1856_v62, %v1038_v63 }
 0x40f   : > { %v1739_v2 = vpop.f32.mrf.mxu1 }
 0x410   : > { %1203 = vrot.lane.b32.xlu0 %v1197_v1, %s1969_s25  ;;  %s1540_s25 = scalar_lea.sflag [#allocation4], %s2141_s21 }
 0x411   : > { %v1190_v3 = vpop.f32.mrf.mxu1 }
 0x412   : > { %v1114_v6 = vpop.f32.mrf.mxu0  ;;  %v1201_v11 = vmul.f32 %v1860_v10, %v1190_v3 }
 0x413   : > { %v1199_v7 = vmul.f32 %v1858_v4, %v1114_v6  ;;  %v1749_v8 = vpop.f32.mrf.mxu1 }
 0x414   : > { %v1744_v9 = vpop.f32.mrf.mxu0 }
 0x415   : > { %1207 = vrot.lane.b32.xlu1 %v1199_v7, %s1970_s27  ;;  %v1653_v9 = vld [vmem:[%s2372_s11] ss:$0 sm:$0xff]  ;;  %s1895_s27 = scalar_lea.vmem %s1554_s16, 128 }
 0x416   : > { %p1896_p11 = scmp.ne.s32.totalorder %s1554_s16, %s1895_s27 }
 0x418   : > { %p1897_p13 = pnand %p1896_p11, %p2398_p12 }
 0x419   : > { %1211 = vrot.lane.b32.xlu1 %v1201_v11, %s1971_s14  ;;  %v1654_v11 = vld [vmem:[%s2373_s12] ss:$0 sm:$0xff]  ;;  %s1972_s14 = smov [#allocation5]  }
 0x41a   : > { %p1898_p1 = pneg %p1897_p13  ;;  %s1899_s29 = sshll.u32 %s1972_s14, 4  ;;  %s1900_s29 = int_to_ptr.vmem [resolvable:$false] %s1899_s29 }
 0x41b   : > { %s1901_s13 = scalar_lea.vmem %s1900_s29, 256  ;;  %p1902_p3 = scmp.lt.s32.totalorder %s1554_s16, %s1900_s29 }
 0x41c   : > { %p1903_p5 = scmp.lt.s32.totalorder %s1901_s13, %s1895_s27 }
 0x41e   : > { %p1904_p8 = por %p1903_p5, %p1902_p3 }
 0x420   : > { %p1905_p10 = pnand %p1904_p8, %p1898_p1 }
 0x482   : > { %v1204_v14 = vpop.permute.xlu0 %1203 }
 0x483   : > { %v1214_v17 = vsel %vm551_vm2, %v1195_v16, %v1204_v14 }
 0x487   : > { %v1208_v15 = vpop.permute.xlu1 %1207 }
 0x488   : > { %v1216_v18 = vsel %vm1215_vm3, %v1214_v17, %v1208_v15 }
 0x48b   : > { %v1212_v19 = vpop.permute.xlu1 %1211 }
 0x48c   : > { %v1218_v20 = vsel %vm1217_vm4, %v1216_v18, %v1212_v19 }
 0x48d   : > { %1759 = vmatmul.mubr.msk.f32.vlgmr.msra.gmra.mxu0 %vm468_vm1, %v1218_v20 }
 0x48e   : > { %1788 = vmatprep.mubr.msk.f32.mxu0 %vm1963_vm0, %v1962_v0  ;;  %1773 = vmatpush3.msra.mxu0 %v1426_v35 }
 0x48f   : > { %1774 = vmatprep.subr.mxu0 %v1962_v0 }
 0x490   : > { %1775 = vmatpush3.msra.mxu0 %v1425_v36 }
 0x491   : > { %1776 = vmatprep.subr.mxu0 %v1962_v0 }
 0x492   : > { %1777 = vmatpush3.msra.mxu0 %v1424_v37 }
 0x493   : > { %1778 = vmatprep.subr.mxu0 %v1962_v0 }
 0x494   : > { %1779 = vmatpush3.msra.mxu0 %v1423_v38 }
 0x495   : > { %1780 = vmatprep.subr.mxu0 %v1962_v0 }
 0x496   : > { %1781 = vmatpush3.msra.mxu0 %v1422_v39 }
 0x497   : > { %1782 = vmatprep.subr.mxu0 %v1962_v0 }
 0x498   : > { %1783 = vmatpush3.msra.mxu0 %v1421_v49 }
 0x499   : > { %1784 = vmatprep.subr.mxu0 %v1962_v0 }
 0x49a   : > { %1785 = vmatpush3.msra.mxu0 %v1420_v50 }
 0x49b   : > { %1786 = vmatprep.subr.mxu0 %v1962_v0 }
 0x49c   : > { %1787 = vmatpush3.msra.mxu0 %v1419_v51 }
 0x54d   : > { %v1299_v22 = vpop.f32.mrf.mxu0 }
 0x54e   : > { %v1300_v23 = vadd.f32 %v1645_v21, %v1299_v22 }
 0x54f   : > { %v1760_v24 = vpop.f32.mrf.mxu0 }
 0x550   : > { %v1303_v25 = vadd.f32 %v1300_v23, %v2171_v5  ;;  %v1336_v5 = vld [vmem:[%s2368_s7 + $0x10] sm:$0xff] }
 0x551   : > { %1764 = vmatpush3.msra.mxu1 %v1336_v5 }
 0x552   : > { %v1304_v26 = vsel %vm468_vm1, %v1303_v25, 0.0  ;;  %1765 = vmatprep.subr.mxu1 %v1962_v0 }
 0x553   : > { %1305 = vadd.xlane.f32.xlu0 %v1304_v26  ;;  %1766 = vmatpush3.msra.mxu1 %v1335_v33 }
 0x554   : > { %1767 = vmatprep.subr.mxu1 %v1962_v0 }
 0x555   : > { %1768 = vmatpush3.msra.mxu1 %v1334_v34 }
 0x5dc   : > { %v1306_v27 = vpop.xlane.xlu0 %1305 }
 0x5dd   : > { %v1308_v28 = vmul.f32 0.03125, %v1306_v27 }
 0x5df   : > { %v1309_v29 = vsub.f32 %v1303_v25, %v1308_v28 }
 0x5e1   : > { %v1310_v30 = vmul.f32 %v1309_v29, %v1309_v29 }
 0x5e3   : > { %v1311_v31 = vsel %vm468_vm1, %v1310_v30, 0.0 }
 0x5e4   : > { %1312 = vadd.xlane.f32.xlu1 %v1311_v31 }
 0x66d   : > { %v1313_v40 = vpop.xlane.xlu1 %1312 }
 0x66e   : > { %v1314_v41 = vmul.f32 0.03125, %v1313_v40 }
 0x670   : > { %v1316_v42 = vadd.f32 1e-05, %v1314_v41 }
 0x672   : > { %1863 = vrsqrt.f32 %v1316_v42 }
 0x67f   : > { %v1864_v43 = vpop.eup %1863 }
 0x680   : > { %v1318_v45 = vmul.f32 %v1864_v43, %v1309_v29 }
 0x682   : > { %v1325_v47 = vmul.f32 %v1647_v44, %v1318_v45 }
 0x684   : > { %v1333_v48 = vadd.f32 %v1648_v46, %v1325_v47 }
 0x686   : > { %1770 = vmatmul.mubr.msk.f32.vlgmr.msra.gmra.mxu1 %vm468_vm1, %v1333_v48 }
 0x746   : > { %v1414_v53 = vpop.f32.mrf.mxu1 }
 0x747   : > { %v1415_v54 = vadd.f32 %v1649_v52, %v1414_v53 }
 0x748   : > { %v1771_v55 = vpop.f32.mrf.mxu1 }
 0x749   : > { %v1418_v56 = vmax.f32 %v1415_v54, 0.0 }
 0x74b   : > { %1789 = vmatmul.mubr.msk.f32.vlgmr.msra.gmra.mxu0 %vm1434_vm5, %v1418_v56 }
 0x80b   : > { %v1504_v0 = vpop.f32.mrf.mxu0 }
 0x80c   : > { %v1505_v58 = vadd.f32 %v1651_v57, %v1504_v0 }
 0x80d   : > { %v1790_v59 = vpop.f32.mrf.mxu0 }
 0x80e   : > { %v1508_v60 = vadd.f32 %v1505_v58, %v1333_v48 }
 0x810   : > { %v1509_v61 = vsel %vm468_vm1, %v1508_v60, 0.0 }
 0x811   : > { %1510 = vadd.xlane.f32.xlu0 %v1509_v61 }
 0x89a   : > { %v1511_v62 = vpop.xlane.xlu0 %1510 }
 0x89b   : > { %v1512_v63 = vmul.f32 0.03125, %v1511_v62 }
 0x89d   : > { %v1513_v1 = vsub.f32 %v1508_v60, %v1512_v63 }
 0x89f   : > { %v1514_v2 = vmul.f32 %v1513_v1, %v1513_v1 }
 0x8a1   : > { %v1515_v3 = vsel %vm468_vm1, %v1514_v2, 0.0 }
 0x8a2   : > { %1516 = vadd.xlane.f32.xlu0 %v1515_v3 }
 0x92b   : > { %v1517_v4 = vpop.xlane.xlu0 %1516 }
 0x92c   : > { %v1518_v6 = vmul.f32 0.03125, %v1517_v4 }
 0x92e   : > { %v1520_v7 = vadd.f32 1e-05, %v1518_v6 }
 0x930   : > { %1865 = vrsqrt.f32 %v1520_v7 }
 0x93d   : > { %v1866_v8 = vpop.eup %1865 }
 0x93e   : > { %v1522_v10 = vmul.f32 %v1866_v8, %v1513_v1 }
 0x940   : > { %v1529_v12 = vmul.f32 %v1653_v9, %v1522_v10 }
 0x942   : > { %v1537_v13 = vadd.f32 %v1654_v11, %v1529_v12 }
 0x944   : > { %1538 = vst.msk [vmem:[%s455_s15] sm:$0xff] %vm468_vm1, %v1537_v13 }
 0x945   : > { %1908 = shalt.err (!%p1905_p10)
}
 0x946   : > { %s1909_s17 = scalar_lea.hbm %s1551_s24, 128  ;;  %s1913_s19 = scalar_lea.hbm %s2397_s23, 256 }
 0x947   : > { %p1910_p2 = scmp.ne.s32.totalorder %s1551_s24, %s1909_s17  ;;  %p1914_p7 = scmp.lt.s32.totalorder %s1551_s24, %s2397_s23 }
 0x948   : > { %p1915_p0 = scmp.lt.s32.totalorder %s1913_s19, %s1909_s17 }
 0x949   : > { %p1911_p4 = pnand %p1910_p2, %p2398_p12 }
 0x94a   : > { %p1916_p6 = por %p1915_p0, %p1914_p7 }
 0x94b   : > { %p1912_p9 = pneg %p1911_p4 }
 0x94d   : > { %p1917_p11 = pnand %p1916_p6, %p1912_p9 }
 0x94f   : > { %1920 = shalt.err (!%p1917_p11)
}
 0x950   : > { %1793 = dma.vmem_to_hbm [thread:$0]  (%p2398_p12), %s1554_s16, 128, %s1551_s24, %s1540_s25  }
 0x951 PF: > { %s2399_s30 = sld [smem:[#allocation8_spill]]  ;;  %p2402_p1 = scmp.ge.s32.totalorder %s1959_s28, 2 }
 0x952   : > { %s2400_s27 = sld [smem:[#allocation12_spill]] }
 0x957   : > { %s1565_s14 = sand.u32 1, %s2399_s30  }
 0x958   : > { %p2401_p13 = scmp.ne.s32.totalorder %s2400_s27, 0  ;;  %s1566_s29 = scalar_lea.sflag [#allocation4], %s1565_s14 }
 0x95a   : > { %p1800_p3 = pnand %p2402_p1, %p2401_p13 }
 0x95c   : > { %p1801_p5 = pneg %p1800_p3 }
 0x95e   : > { %1942 = dma.done.wait (%p1801_p5), %s1566_s29, 128  }
 0x95f   : > { %1944 = vsyncadd (%p1801_p5), %s1566_s29, 4294967168  ;;  %s2403_s28 = sld [smem:[#allocation10_spill]]  ;;  %s2406_s25 = smov %s1951_s26 }
 0x960   : > { %s2404_s13 = sld [smem:[#allocation9_spill]] }
 0x961   : > { %s2405_s27 = sld [smem:[#allocation11_spill]] }
 0x965   : > { %p26_p8 = scmp.ge.s32.totalorder %s2403_s28, 4  }
 0x966   : > { %s2407_s26 = smov %s2404_s13 }
 0x967   :  { %28 = sbr.rel (!%p26_p8) target bundleno = 7 (0x7), region = 117 }
 0x96c   :  { %1571 = vsyncpa [#allocation3], 1 }
 0x96d   :  { %1573 = vsyncpa [#allocation3 + $0x1], 1 }
 0x96e   :  { %1574 = vsyncpa [#allocation4], 1 }
 0x96f   :  { %1576 = vsyncpa [#allocation4 + $0x1], 1 }

// kernel: tpu_custom_call.1
= control target key start
LH: loop header
LB: loop body
LE: loop exit
PB: predicated region body
PF: predicated region fallthrough
CT: control target
= control target key end

     0   :  { %s2361_s0 = inlined_call_operand.hbm [shape: f32[2,8,32], index: 0, kind: input, shape index: {}]   ;;  %s2362_s1 = inlined_call_operand.vmem [shape: f32[32,96], index: 1, kind: input, shape index: {}]   ;;  %s2363_s2 = inlined_call_operand.vmem [shape: f32[1,96], index: 2, kind: input, shape index: {}]   ;;  %s2364_s3 = inlined_call_operand.vmem [shape: f32[32,32], index: 3, kind: input, shape index: {}]   ;;  %s2365_s4 = inlined_call_operand.vmem [shape: f32[1,32], index: 4, kind: input, shape index: {}]   ;;  %s2366_s5 = inlined_call_operand.vmem [shape: f32[1,32], index: 5, kind: input, shape index: {}]   ;;  %s2367_s6 = inlined_call_operand.vmem [shape: f32[1,32], index: 6, kind: input, shape index: {}]   ;;  %s2368_s7 = inlined_call_operand.vmem [shape: f32[32,64], index: 7, kind: input, shape index: {}]   ;;  %s2369_s8 = inlined_call_operand.vmem [shape: f32[1,64], index: 8, kind: input, shape index: {}]   ;;  %s2370_s9 = inlined_call_operand.vmem [shape: f32[64,32], index: 9, kind: input, shape index: {}]   ;;  %s2371_s10 = inlined_call_operand.vmem [shape: f32[1,32], index: 10, kind: input, shape index: {}]   ;;  %s2372_s11 = inlined_call_operand.vmem [shape: f32[1,32], index: 11, kind: input, shape index: {}]   ;;  %s2373_s12 = inlined_call_operand.vmem [shape: f32[1,32], index: 12, kind: input, shape index: {}]   ;;  %s2374_s13 = inlined_call_operand.hbm [shape: f32[2,8,32], index: 13, kind: output, shape index: {}]  }
   0x1   :  { %2383 = sst [smem:[#allocation13_spill]] %s2374_s13 }
   0x2   :  { %18 = vsyncpa [#allocation3], 0 }
   0x3   :  { %20 = vsyncpa [#allocation3 + $0x1], 0 }
   0x4   :  { %21 = vsyncpa [#allocation4], 0 }
   0x5   :  { %23 = vsyncpa [#allocation4 + $0x1], 0  ;;  %s2043_s25 = smov 0   ;;  %s2045_s26 = smov 0  }
   0x6   :  { %s2047_s27 = smov 0   ;;  %s2049_s28 = smov 0  }
   0x7 LB: > { %2384 = sst [smem:[#allocation8_spill]] %s1947_s25  ;;  %s2064_s29 = sadd.s32 4294967295, %s1959_s28   ;;  %s1959_s28 = sphi %s2049_s28, %s2403_s28   ;;  %s1955_s27 = sphi %s2047_s27, %s2405_s27   ;;  %s1951_s26 = sphi %s2045_s26, %s2407_s26   ;;  %s1947_s25 = sphi %s2043_s25, %s2406_s25  }
   0x8   : > { %2385 = sst [smem:[#allocation9_spill]] %s1955_s27  ;;  %s1623_s30 = sadd.s32 4294967294, %s1959_s28  }
   0x9   : > { %s2068_s14 = sadd.s32 1, %s1959_s28   ;;  %s36_s15 = sadd.s32 1, %s1955_s27 }
   0xa   : > { %2386 = sst [smem:[#allocation10_spill]] %s2068_s14  ;;  %s33_s16 = ssub.s32 %s1959_s28, %s2068_s14 }
   0xb   : > { %p43_p0 = scmp.ne.s32.totalorder %s1955_s27, %s1951_s26  ;;  %p34_p1 = scmp.eq.s32.totalorder %s33_s16, 0 }
   0xc   : > { %p44_p2 = scmp.eq.s32.totalorder %s1959_s28, 0  ;;  %p49_p3 = scmp.ne.s32.totalorder %s1951_s26, %s1947_s25 }
   0xd   : > { %p50_p4 = scmp.eq.s32.totalorder %s2064_s29, 0  ;;  %p325_p7 = scmp.eq.s32.totalorder %s2064_s29, 1 }
   0xe   : > { %s2080_s17 = scalar_select %p34_p1, %s1955_s27, %s36_s15  }
   0xf   : > { %p2082_p5 = por %p44_p2, %p43_p0  ;;  %p2086_p6 = por %p50_p4, %p49_p3 }
  0x10   : > { %2387 = sst [smem:[#allocation11_spill]] %s2080_s17  ;;  %p331_p8 = scmp.eq.s32.totalorder %s1623_s30, 1 }
  0x11   : > { %s2389_s19 = scalar_select %p2086_p6, 1, 0 }
  0x12   : > { %p1803_p10 = scmp.lt.s32.totalorder %s1959_s28, 2  ;;  %p2093_p11 = por %p325_p7, %p43_p0 }
  0x13   : > { %p2097_p12 = por %p331_p8, %p49_p3  ;;  %s387_s22 = sand.u32 1, %s1955_s27  }
  0x14   : > { %s2390_s20 = scalar_select %p2093_p11, 1, 0 }
  0x15   : > { %s2391_s21 = scalar_select %p2097_p12, 1, 0 }
  0x16   : > { %s1627_s23 = sshll.u32 %s1959_s28, 7  ;;  %s1626_s24 = sshll.u32 %s387_s22, 3 }
  0x17   : > { %2392 = sst [smem:[#allocation12_spill]] %s2391_s21  ;;  %s2106_s17 = scalar_lea.hbm %s2361_s0, %s1627_s23 }
  0x18   : > { %s391_s30 = scalar_lea.vmem [#allocation2], %s1626_s24  ;;  %p2110_p13 = pnand %p1803_p10, %p2082_p5 }
  0x19   : > { %s398_s14 = sshll.u32 %s391_s30, 4  ;;  %s388_s27 = scalar_lea.sflag [#allocation3], %s387_s22  ;;  %s2114_s14 = int_to_ptr.vmem [resolvable:$true] %s398_s14 }
  0x1a   : > { %s1867_s21 = scalar_lea.hbm %s2106_s17, 128  ;;  %p1869_p3 = pneg %p2110_p13 }
  0x1b   : > { %p1868_p2 = scmp.ne.s32.totalorder %s2106_s17, %s1867_s21  ;;  %s1872_s18 = scalar_lea.hbm %s2361_s0, 256 }
  0x1c   : > { %p1873_p5 = scmp.lt.s32.totalorder %s2106_s17, %s2361_s0  ;;  %p1874_p8 = scmp.lt.s32.totalorder %s1872_s18, %s1867_s21 }
  0x1d   : > { %p1870_p4 = pnand %p1869_p3, %p1868_p2 }
  0x1e   : > { %p1875_p10 = por %p1874_p8, %p1873_p5 }
  0x1f   : > { %p1871_p7 = pneg %p1870_p4 }
  0x21   : > { %p1876_p9 = pnand %p1875_p10, %p1871_p7 }
  0x23   : > { %1879 = shalt.err (!%p1876_p9)
}
  0x24   : > { %s1880_s22 = scalar_lea.vmem %s2114_s14, 128  ;;  %s1961_s30 = smov [#allocation2]  }
  0x25   : > { %p1881_p0 = scmp.ne.s32.totalorder %s2114_s14, %s1880_s22  ;;  %s1885_s13 = sshll.u32 %s1961_s30, 4  ;;  %s1886_s13 = int_to_ptr.vmem [resolvable:$false] %s1885_s13 }
  0x26   : > { %s1887_s23 = scalar_lea.vmem %s1886_s13, 256  ;;  %p1888_p4 = scmp.lt.s32.totalorder %s2114_s14, %s1886_s13 }
  0x27   : > { %p1883_p1 = pnand %p1881_p0, %p1869_p3  ;;  %p1889_p12 = scmp.lt.s32.totalorder %s1887_s23, %s1880_s22 }
  0x29   : > { %p1884_p2 = pneg %p1883_p1  ;;  %p1890_p11 = por %p1889_p12, %p1888_p4 }
  0x2b   : > { %p1891_p6 = pnand %p1890_p11, %p1884_p2 }
  0x2d   : > { %1894 = shalt.err (!%p1891_p6)
}
  0x2e   : > { %1798 = dma.hbm_to_vmem [thread:$0]  (!%p2110_p13), %s2106_s17, 128, %s2114_s14, %s388_s27  }
  0x2f   : > { %p2394_p9 = scmp.lt.s32.totalorder %s1959_s28, 3  ;;  %p2395_p7 = scmp.ge.s32.totalorder %s1959_s28, 1 }
  0x31   : > { %p404_p0 = pnand %p2395_p7, %p2394_p9 }
  0x32   : > { %s2141_s21 = sand.u32 (!%p404_p0), 1, %s1951_s26   ;;  %p2396_p6 = scmp.ne.s32.totalorder (!%p404_p0), %s2389_s19, 0 }
  0x33   : > { %407 = sbr.rel (%p404_p0) target bundleno = 2385 (0x951), region = 72  ;;  %s1629_s13 = sshll.u32 (!%p404_p0), %s2141_s21, 3 }
  0x34   : > { %s410_s24 = scalar_lea.sflag (!%p404_p0), [#allocation3], %s2141_s21  ;;  %s413_s25 = scalar_lea.vmem (!%p404_p0), [#allocation2], %s1629_s13 }
  0x38   : > { %1938 = dma.done.wait (%p2396_p6), %s410_s24, 128  }
  0x39   : > { %1940 = vsyncadd (%p2396_p6), %s410_s24, 4294967168  ;;  %v1962_v0 = vmov 0.0   ;;  %vm1963_vm0 = vmmov 0   ;;  %v460_v1 = vld [vmem:[%s2362_s1 + $0x18] sm:$0xff]  ;;  %v459_v2 = vld [vmem:[%s2362_s1 + $0x10] sm:$0xff]  ;;  %vm468_vm1 = vcmask 261120  }
  0x3a   : > { %1699 = vmatprep.subr.mxu1 %v1962_v0  ;;  %1707 = vmatprep.mubr.msk.f32.mxu1 %vm1963_vm0, %v1962_v0  ;;  %v458_v3 = vld [vmem:[%s2362_s1 + $0x8] sm:$0xff]  ;;  %v457_v4 = vld [vmem:[%s2362_s1] sm:$0xff]  ;;  %s1964_s24 = smov 104   ;;  %s1966_s27 = smov 96   ;;  %vm551_vm2 = vcmask 64512   ;;  %v1222_v57 = vld [vmem:[%s2364_s3 + $0x18] sm:$0xff] }
  0x3b   : > { %1720 = vmatprep.subr.mxu0 %v1962_v0  ;;  %1722 = vmatprep.mubr.msk.f32.mxu0 %vm1963_vm0, %v1962_v0  ;;  %v2171_v5 = vld [vmem:[%s413_s25] sm:$0xff]  ;;  %s1965_s25 = smov 120   ;;  %s1967_s14 = smov 112   ;;  %v1221_v59 = vld [vmem:[%s2364_s3 + $0x10] sm:$0xff]  ;;  %vm1215_vm3 = vcmask 130048   ;;  %vm1217_vm4 = vcmask 195584  }
  0x3c   : > { %1700 = vmatpush3.msra.mxu1 %v460_v1  ;;  %v1631_v6 = vld [vmem:[%s2363_s2] ss:$0 sm:$0xff]  ;;  %s1968_s17 = smov 64   ;;  %v1220_v60 = vld [vmem:[%s2364_s3 + $0x8] sm:$0xff]  ;;  %vm1434_vm5 = vcmask 523264   ;;  %s1656_s19 = sshll.u32 %s2064_s29, 7 }
  0x3d   : > { %1701 = vmatprep.subr.mxu1 %v1962_v0  ;;  %v1219_v61 = vld [vmem:[%s2364_s3] sm:$0xff]  ;;  %s455_s15 = scalar_lea.vmem [#allocation5], %s1629_s13  ;;  %s2397_s23 = sld [smem:[#allocation13_spill]] }
  0x3e   : > { %1702 = vmatpush3.msra.mxu1 %v459_v2  ;;  %s1553_s16 = sshll.u32 %s455_s15, 4  ;;  %p2398_p12 = scmp.ne.s32.totalorder %s2390_s20, 0  ;;  %s1554_s16 = int_to_ptr.vmem [resolvable:$true] %s1553_s16 }
  0x3f   : > { %1703 = vmatprep.subr.mxu1 %v1962_v0 }
  0x40   : > { %1704 = vmatpush3.msra.mxu1 %v458_v3 }
  0x41   : > { %1705 = vmatprep.subr.mxu1 %v1962_v0 }
  0x42   : > { %1706 = vmatpush3.msra.mxu1 %v457_v4 }
  0x43   : > { %1708 = vmatmul.mubr.msk.f32.vlgmr.msra.gmra.mxu1 %vm468_vm1, %v2171_v5  ;;  %1710 = vmatprep.subr.mxu1 %v1962_v0 }
  0x44   : > { %1712 = vmatprep.mubr.msk.f32.mxu1 %vm1963_vm0, %v1962_v0 }
 0x103   : > { %v538_v7 = vpop.f32.mrf.mxu1 }
 0x104   : > { %v539_v8 = vadd.f32 %v1631_v6, %v538_v7 }
 0x105   : > { %v1709_v9 = vpop.f32.mrf.mxu1 }
 0x106   : > { %547 = vrot.lane.b32.xlu1 %v539_v8, %s1964_s24  ;;  %543 = vrot.lane.b32.xlu0 %v539_v8, %s1965_s25  ;;  %s1969_s25 = smov 8   ;;  %s1551_s24 = scalar_lea.hbm %s2397_s23, %s1656_s19 }
 0x10a   : > { %549 = vrot.lane.b32.xlu1 %v539_v8, %s1966_s27  ;;  %545 = vrot.lane.b32.xlu0 %v539_v8, %s1967_s14  ;;  %s1971_s14 = smov 24  }
 0x178   : > { %v548_v10 = vpop.permute.xlu1 %547  ;;  %v544_v11 = vpop.permute.xlu0 %543 }
 0x179   : > { %626 = vrot.lane.b32.xlu0 %v544_v11, %s1966_s27 }
 0x17c   : > { %v550_v12 = vpop.permute.xlu1 %549  ;;  %v546_v13 = vpop.permute.xlu0 %545 }
 0x17d   : > { %1711 = vmatpush3.xpose.msk.msra.mxu1 %vm551_vm2, %v550_v12  ;;  %778 = vrot.lane.b32.xlu0 %v548_v10, %s1966_s27 }
 0x17e   : > { %702 = vrot.lane.b32.xlu1 %v546_v13, %s1966_s27  ;;  %1715 = vmatprep.subr.mxu1 %v1962_v0  ;;  %s1970_s27 = smov 16  }
 0x180   : > { %1713 = vmatmul.mubr.msk.f32.vlgmr.msra.gmra.mxu1 %vm551_vm2, %v539_v8 }
 0x181   : > { %890 = vrot.lane.b32.xlu0 %v539_v8, %s1968_s17  ;;  %1717 = vmatprep.mubr.msk.f32.mxu1 %vm1963_vm0, %v1962_v0 }
 0x182   : > { %966 = vrot.lane.b32.xlu1 %v544_v11, %s1968_s17 }
 0x1eb   : > { %v627_v14 = vpop.permute.xlu0 %626 }
 0x1ec   : > { %1716 = vmatpush3.xpose.msk.msra.mxu1 %vm551_vm2, %v627_v14 }
 0x1ed   : > { %1725 = vmatprep.subr.mxu1 %v1962_v0 }
 0x1ef   : > { %1718 = vmatmul.mubr.msk.f32.vlgmr.msra.gmra.mxu1 %vm551_vm2, %v544_v11  ;;  %v779_v15 = vpop.permute.xlu0 %778 }
 0x1f0   : > { %v703_v16 = vpop.permute.xlu1 %702  ;;  %1726 = vmatpush3.xpose.msk.msra.mxu1 %vm551_vm2, %v779_v15  ;;  %1727 = vmatprep.mubr.msk.f32.mxu1 %vm1963_vm0, %v1962_v0 }
 0x1f1   : > { %1721 = vmatpush3.xpose.msk.msra.mxu0 %vm551_vm2, %v703_v16  ;;  %1735 = vmatprep.subr.mxu1 %v1962_v0 }
 0x1f2   : > { %1730 = vmatprep.subr.mxu0 %v1962_v0 }
 0x1f3   : > { %1728 = vmatmul.mubr.msk.f32.vlgmr.msra.gmra.mxu1 %vm551_vm2, %v548_v10  ;;  %v891_v17 = vpop.permute.xlu0 %890 }
 0x1f4   : > { %1723 = vmatmul.mubr.msk.f32.vlgmr.msra.gmra.mxu0 %vm551_vm2, %v546_v13  ;;  %v967_v18 = vpop.permute.xlu1 %966  ;;  %1737 = vmatprep.mubr.msk.f32.mxu1 %vm1963_vm0, %v1962_v0 }
 0x1f5   : > { %1731 = vmatpush3.msra.mxu0 %v891_v17  ;;  %1736 = vmatpush3.msra.mxu1 %v967_v18 }
 0x1f6   : > { %1732 = vmatprep.mubr.msk.f32.mxu0 %vm1963_vm0, %v1962_v0  ;;  %1740 = vmatprep.subr.mxu0 %v1962_v0 }
 0x1f7   : > { %1745 = vmatprep.subr.mxu1 %v1962_v0 }
 0x240   : > { %v622_v19 = vpop.f32.mrf.mxu1 }
 0x241   : > { %v854_v20 = vsel %vm551_vm2, %v622_v19, -inf }
 0x242   : > { %855 = vmax.xlane.f32.xlu1 %v854_v20  ;;  %v1714_v21 = vpop.f32.mrf.mxu1 }
 0x243   : > { %v1645_v21 = vld [vmem:[%s2365_s4] ss:$0 sm:$0xff] }
 0x2af   : > { %v698_v22 = vpop.f32.mrf.mxu1 }
 0x2b0   : > { %v857_v23 = vsel %vm551_vm2, %v698_v22, -inf }
 0x2b1   : > { %858 = vmax.xlane.f32.xlu0 %v857_v23  ;;  %v1719_v24 = vpop.f32.mrf.mxu1 }
 0x2b3   : > { %v850_v25 = vpop.f32.mrf.mxu1 }
 0x2b4   : > { %v774_v26 = vpop.f32.mrf.mxu0  ;;  %v863_v27 = vsel %vm551_vm2, %v850_v25, -inf }
 0x2b5   : > { %v860_v28 = vsel %vm551_vm2, %v774_v26, -inf  ;;  %864 = vmax.xlane.f32.xlu1 %v863_v27  ;;  %v1729_v29 = vpop.f32.mrf.mxu1 }
 0x2b6   : > { %v1724_v30 = vpop.f32.mrf.mxu0  ;;  %861 = vmax.xlane.f32.xlu0 %v860_v28 }
 0x2c6   : > { %1042 = vrot.lane.b32.xlu1 %v546_v13, %s1968_s17 }
 0x2cb   : > { %v856_v31 = vpop.xlane.xlu1 %855 }
 0x2cc   : > { %v866_v32 = vsub.f32 %v622_v19, %v856_v31  ;;  %1118 = vrot.lane.b32.xlu0 %v548_v10, %s1968_s17 }
 0x2ce   : > { %v870_v33 = vmul.f32 1.442695, %v866_v32  ;;  %v1337_v32 = vld [vmem:[%s2368_s7 + $0x18] sm:$0xff] }
 0x2d0   : > { %1847 = vpow2.f32 %v870_v33  ;;  %v1335_v33 = vld [vmem:[%s2368_s7 + $0x8] sm:$0xff] }
 0x2dd   : > { %v1848_v34 = vpop.eup %1847 }
 0x2de   : > { %1733 = vmatmul.mubr.msk.f32.vlgmr.msra.gmra.mxu0 %vm551_vm2, %v1848_v34  ;;  %v878_v50 = vsel %vm551_vm2, %v1848_v34, 0.0  ;;  %v1334_v34 = vld [vmem:[%s2368_s7] sm:$0xff] }
 0x2df   : > { %1742 = vmatprep.mubr.msk.f32.mxu0 %vm1963_vm0, %v1962_v0 }
 0x33a   : > { %v859_v35 = vpop.xlane.xlu0 %858 }
 0x33b   : > { %v867_v36 = vsub.f32 %v698_v22, %v859_v35  ;;  %v1426_v35 = vld [vmem:[%s2370_s9 + $0x38] sm:$0xff] }
 0x33d   : > { %v872_v37 = vmul.f32 1.442695, %v867_v36  ;;  %v1425_v36 = vld [vmem:[%s2370_s9 + $0x30] sm:$0xff] }
 0x33e   : > { %v865_v38 = vpop.xlane.xlu1 %864 }
 0x33f   : > { %1849 = vpow2.f32 %v872_v37  ;;  %v862_v39 = vpop.xlane.xlu0 %861  ;;  %v869_v40 = vsub.f32 %v850_v25, %v865_v38  ;;  %v1424_v37 = vld [vmem:[%s2370_s9 + $0x28] sm:$0xff]  ;;  %v1423_v38 = vld [vmem:[%s2370_s9 + $0x20] sm:$0xff] }
 0x340   : > { %v868_v41 = vsub.f32 %v774_v26, %v862_v39  ;;  %v1422_v39 = vld [vmem:[%s2370_s9 + $0x18] sm:$0xff] }
 0x341   : > { %v876_v42 = vmul.f32 1.442695, %v869_v40 }
 0x342   : > { %v874_v43 = vmul.f32 1.442695, %v868_v41  ;;  %v1043_v44 = vpop.permute.xlu1 %1042 }
 0x343   : > { %1851 = vpow2.f32 %v876_v42  ;;  %1741 = vmatpush3.msra.mxu0 %v1043_v44  ;;  %v1119_v46 = vpop.permute.xlu0 %1118  ;;  %v1647_v44 = vld [vmem:[%s2366_s5] ss:$0 sm:$0xff] }
 0x344   : > { %1853 = vpow2.f32 %v874_v43  ;;  %1750 = vmatprep.subr.mxu0 %v1962_v0 }
 0x34c   : > { %v1850_v45 = vpop.eup %1849 }
 0x34d   : > { %1738 = vmatmul.mubr.msk.f32.vlgmr.msra.gmra.mxu1 %vm551_vm2, %v1850_v45  ;;  %v881_v47 = vsel %vm551_vm2, %v1850_v45, 0.0 }
 0x34e   : > { %1746 = vmatpush3.msra.mxu1 %v1119_v46  ;;  %882 = vadd.xlane.f32.xlu1 %v881_v47  ;;  %v1648_v46 = vld [vmem:[%s2367_s6] ss:$0 sm:$0xff] }
 0x34f   : > { %1747 = vmatprep.mubr.msk.f32.mxu1 %vm1963_vm0, %v1962_v0  ;;  %1761 = vmatprep.subr.mxu1 %v1962_v0 }
 0x350   : > { %v1852_v48 = vpop.eup %1851 }
 0x351   : > { %v1854_v49 = vpop.eup %1853  ;;  %1748 = vmatmul.mubr.msk.f32.vlgmr.msra.gmra.mxu1 %vm551_vm2, %v1852_v48  ;;  %v887_v52 = vsel %vm551_vm2, %v1852_v48, 0.0 }
 0x352   : > { %1743 = vmatmul.mubr.msk.f32.vlgmr.msra.gmra.mxu0 %vm551_vm2, %v1854_v49  ;;  %v884_v51 = vsel %vm551_vm2, %v1854_v49, 0.0  ;;  %879 = vadd.xlane.f32.xlu1 %v878_v50  ;;  %v1421_v49 = vld [vmem:[%s2370_s9 + $0x10] sm:$0xff]  ;;  %v1420_v50 = vld [vmem:[%s2370_s9 + $0x8] sm:$0xff] }
 0x353   : > { %885 = vadd.xlane.f32.xlu0 %v884_v51  ;;  %1758 = vmatprep.mubr.msk.f32.mxu0 %vm1963_vm0, %v1962_v0  ;;  %v1419_v51 = vld [vmem:[%s2370_s9] sm:$0xff] }
 0x354   : > { %1769 = vmatprep.mubr.msk.f32.mxu1 %vm1963_vm0, %v1962_v0  ;;  %1751 = vmatpush3.msra.mxu0 %v1222_v57  ;;  %v1651_v57 = vld [vmem:[%s2371_s10] ss:$0 sm:$0xff] }
 0x355   : > { %1752 = vmatprep.subr.mxu0 %v1962_v0  ;;  %1762 = vmatpush3.msra.mxu1 %v1337_v32 }
 0x356   : > { %1753 = vmatpush3.msra.mxu0 %v1221_v59  ;;  %1763 = vmatprep.subr.mxu1 %v1962_v0 }
 0x357   : > { %888 = vadd.xlane.f32.xlu0 %v887_v52  ;;  %1754 = vmatprep.subr.mxu0 %v1962_v0  ;;  %v1649_v52 = vld [vmem:[%s2369_s8] ss:$0 sm:$0xff] }
 0x358   : > { %1755 = vmatpush3.msra.mxu0 %v1220_v60 }
 0x359   : > { %1756 = vmatprep.subr.mxu0 %v1962_v0 }
 0x35a   : > { %1757 = vmatpush3.msra.mxu0 %v1219_v61 }
 0x35b   : > { %1772 = vmatprep.subr.mxu0 %v1962_v0 }
 0x39e   : > { %v962_v53 = vpop.f32.mrf.mxu0 }
 0x3a0   : > { %v1734_v54 = vpop.f32.mrf.mxu0 }
 0x3d7   : > { %v883_v55 = vpop.xlane.xlu1 %882 }
 0x3d8   : > { %1855 = vrcp.f32 %v883_v55 }
 0x3db   : > { %v880_v12 = vpop.xlane.xlu1 %879 }
 0x3dc   : > { %v886_v56 = vpop.xlane.xlu0 %885 }
 0x3dd   : > { %1857 = vrcp.f32 %v886_v56 }
 0x3e0   : > { %v889_v58 = vpop.xlane.xlu0 %888 }
 0x3e1   : > { %1859 = vrcp.f32 %v889_v58 }
 0x3e2   : > { %1861 = vrcp.f32 %v880_v12 }
 0x3e5   : > { %v1856_v62 = vpop.eup %1855 }
 0x3ea   : > { %v1858_v4 = vpop.eup %1857 }
 0x3ee   : > { %v1860_v10 = vpop.eup %1859 }
 0x3ef   : > { %v1862_v13 = vpop.eup %1861 }
 0x3f0   : > { %v1195_v16 = vmul.f32 %v1862_v13, %v962_v53 }
 0x40d   : > { %v1038_v63 = vpop.f32.mrf.mxu1 }
 0x40e   : > { %v1197_v1 = vmul.f32 %v1856_v62, %v1038_v63 }
 0x40f   : > { %v1739_v2 = vpop.f32.mrf.mxu1 }
 0x410   : > { %1203 = vrot.lane.b32.xlu0 %v1197_v1, %s1969_s25  ;;  %s1540_s25 = scalar_lea.sflag [#allocation4], %s2141_s21 }
 0x411   : > { %v1190_v3 = vpop.f32.mrf.mxu1 }
 0x412   : > { %v1114_v6 = vpop.f32.mrf.mxu0  ;;  %v1201_v11 = vmul.f32 %v1860_v10, %v1190_v3 }
 0x413   : > { %v1199_v7 = vmul.f32 %v1858_v4, %v1114_v6  ;;  %v1749_v8 = vpop.f32.mrf.mxu1 }
 0x414   : > { %v1744_v9 = vpop.f32.mrf.mxu0 }
 0x415   : > { %1207 = vrot.lane.b32.xlu1 %v1199_v7, %s1970_s27  ;;  %v1653_v9 = vld [vmem:[%s2372_s11] ss:$0 sm:$0xff]  ;;  %s1895_s27 = scalar_lea.vmem %s1554_s16, 128 }
 0x416   : > { %p1896_p11 = scmp.ne.s32.totalorder %s1554_s16, %s1895_s27 }
 0x418   : > { %p1897_p13 = pnand %p1896_p11, %p2398_p12 }
 0x419   : > { %1211 = vrot.lane.b32.xlu1 %v1201_v11, %s1971_s14  ;;  %v1654_v11 = vld [vmem:[%s2373_s12] ss:$0 sm:$0xff]  ;;  %s1972_s14 = smov [#allocation5]  }
 0x41a   : > { %p1898_p1 = pneg %p1897_p13  ;;  %s1899_s29 = sshll.u32 %s1972_s14, 4  ;;  %s1900_s29 = int_to_ptr.vmem [resolvable:$false] %s1899_s29 }
 0x41b   : > { %s1901_s13 = scalar_lea.vmem %s1900_s29, 256  ;;  %p1902_p3 = scmp.lt.s32.totalorder %s1554_s16, %s1900_s29 }
 0x41c   : > { %p1903_p5 = scmp.lt.s32.totalorder %s1901_s13, %s1895_s27 }
 0x41e   : > { %p1904_p8 = por %p1903_p5, %p1902_p3 }
 0x420   : > { %p1905_p10 = pnand %p1904_p8, %p1898_p1 }
 0x482   : > { %v1204_v14 = vpop.permute.xlu0 %1203 }
 0x483   : > { %v1214_v17 = vsel %vm551_vm2, %v1195_v16, %v1204_v14 }
 0x487   : > { %v1208_v15 = vpop.permute.xlu1 %1207 }
 0x488   : > { %v1216_v18 = vsel %vm1215_vm3, %v1214_v17, %v1208_v15 }
 0x48b   : > { %v1212_v19 = vpop.permute.xlu1 %1211 }
 0x48c   : > { %v1218_v20 = vsel %vm1217_vm4, %v1216_v18, %v1212_v19 }
 0x48d   : > { %1759 = vmatmul.mubr.msk.f32.vlgmr.msra.gmra.mxu0 %vm468_vm1, %v1218_v20 }
 0x48e   : > { %1788 = vmatprep.mubr.msk.f32.mxu0 %vm1963_vm0, %v1962_v0  ;;  %1773 = vmatpush3.msra.mxu0 %v1426_v35 }
 0x48f   : > { %1774 = vmatprep.subr.mxu0 %v1962_v0 }
 0x490   : > { %1775 = vmatpush3.msra.mxu0 %v1425_v36 }
 0x491   : > { %1776 = vmatprep.subr.mxu0 %v1962_v0 }
 0x492   : > { %1777 = vmatpush3.msra.mxu0 %v1424_v37 }
 0x493   : > { %1778 = vmatprep.subr.mxu0 %v1962_v0 }
 0x494   : > { %1779 = vmatpush3.msra.mxu0 %v1423_v38 }
 0x495   : > { %1780 = vmatprep.subr.mxu0 %v1962_v0 }
 0x496   : > { %1781 = vmatpush3.msra.mxu0 %v1422_v39 }
 0x497   : > { %1782 = vmatprep.subr.mxu0 %v1962_v0 }
 0x498   : > { %1783 = vmatpush3.msra.mxu0 %v1421_v49 }
 0x499   : > { %1784 = vmatprep.subr.mxu0 %v1962_v0 }
 0x49a   : > { %1785 = vmatpush3.msra.mxu0 %v1420_v50 }
 0x49b   : > { %1786 = vmatprep.subr.mxu0 %v1962_v0 }
 0x49c   : > { %1787 = vmatpush3.msra.mxu0 %v1419_v51 }
 0x54d   : > { %v1299_v22 = vpop.f32.mrf.mxu0 }
 0x54e   : > { %v1300_v23 = vadd.f32 %v1645_v21, %v1299_v22 }
 0x54f   : > { %v1760_v24 = vpop.f32.mrf.mxu0 }
 0x550   : > { %v1303_v25 = vadd.f32 %v1300_v23, %v2171_v5  ;;  %v1336_v5 = vld [vmem:[%s2368_s7 + $0x10] sm:$0xff] }
 0x551   : > { %1764 = vmatpush3.msra.mxu1 %v1336_v5 }
 0x552   : > { %v1304_v26 = vsel %vm468_vm1, %v1303_v25, 0.0  ;;  %1765 = vmatprep.subr.mxu1 %v1962_v0 }
 0x553   : > { %1305 = vadd.xlane.f32.xlu0 %v1304_v26  ;;  %1766 = vmatpush3.msra.mxu1 %v1335_v33 }
 0x554   : > { %1767 = vmatprep.subr.mxu1 %v1962_v0 }
 0x555   : > { %1768 = vmatpush3.msra.mxu1 %v1334_v34 }
 0x5dc   : > { %v1306_v27 = vpop.xlane.xlu0 %1305 }
 0x5dd   : > { %v1308_v28 = vmul.f32 0.03125, %v1306_v27 }
 0x5df   : > { %v1309_v29 = vsub.f32 %v1303_v25, %v1308_v28 }
 0x5e1   : > { %v1310_v30 = vmul.f32 %v1309_v29, %v1309_v29 }
 0x5e3   : > { %v1311_v31 = vsel %vm468_vm1, %v1310_v30, 0.0 }
 0x5e4   : > { %1312 = vadd.xlane.f32.xlu1 %v1311_v31 }
 0x66d   : > { %v1313_v40 = vpop.xlane.xlu1 %1312 }
 0x66e   : > { %v1314_v41 = vmul.f32 0.03125, %v1313_v40 }
 0x670   : > { %v1316_v42 = vadd.f32 1e-05, %v1314_v41 }
 0x672   : > { %1863 = vrsqrt.f32 %v1316_v42 }
 0x67f   : > { %v1864_v43 = vpop.eup %1863 }
 0x680   : > { %v1318_v45 = vmul.f32 %v1864_v43, %v1309_v29 }
 0x682   : > { %v1325_v47 = vmul.f32 %v1647_v44, %v1318_v45 }
 0x684   : > { %v1333_v48 = vadd.f32 %v1648_v46, %v1325_v47 }
 0x686   : > { %1770 = vmatmul.mubr.msk.f32.vlgmr.msra.gmra.mxu1 %vm468_vm1, %v1333_v48 }
 0x746   : > { %v1414_v53 = vpop.f32.mrf.mxu1 }
 0x747   : > { %v1415_v54 = vadd.f32 %v1649_v52, %v1414_v53 }
 0x748   : > { %v1771_v55 = vpop.f32.mrf.mxu1 }
 0x749   : > { %v1418_v56 = vmax.f32 %v1415_v54, 0.0 }
 0x74b   : > { %1789 = vmatmul.mubr.msk.f32.vlgmr.msra.gmra.mxu0 %vm1434_vm5, %v1418_v56 }
 0x80b   : > { %v1504_v0 = vpop.f32.mrf.mxu0 }
 0x80c   : > { %v1505_v58 = vadd.f32 %v1651_v57, %v1504_v0 }
 0x80d   : > { %v1790_v59 = vpop.f32.mrf.mxu0 }
 0x80e   : > { %v1508_v60 = vadd.f32 %v1505_v58, %v1333_v48 }
 0x810   : > { %v1509_v61 = vsel %vm468_vm1, %v1508_v60, 0.0 }
 0x811   : > { %1510 = vadd.xlane.f32.xlu0 %v1509_v61 }
 0x89a   : > { %v1511_v62 = vpop.xlane.xlu0 %1510 }
 0x89b   : > { %v1512_v63 = vmul.f32 0.03125, %v1511_v62 }
 0x89d   : > { %v1513_v1 = vsub.f32 %v1508_v60, %v1512_v63 }
 0x89f   : > { %v1514_v2 = vmul.f32 %v1513_v1, %v1513_v1 }
 0x8a1   : > { %v1515_v3 = vsel %vm468_vm1, %v1514_v2, 0.0 }
 0x8a2   : > { %1516 = vadd.xlane.f32.xlu0 %v1515_v3 }
 0x92b   : > { %v1517_v4 = vpop.xlane.xlu0 %1516 }
 0x92c   : > { %v1518_v6 = vmul.f32 0.03125, %v1517_v4 }
 0x92e   : > { %v1520_v7 = vadd.f32 1e-05, %v1518_v6 }
 0x930   : > { %1865 = vrsqrt.f32 %v1520_v7 }
 0x93d   : > { %v1866_v8 = vpop.eup %1865 }
 0x93e   : > { %v1522_v10 = vmul.f32 %v1866_v8, %v1513_v1 }
 0x940   : > { %v1529_v12 = vmul.f32 %v1653_v9, %v1522_v10 }
 0x942   : > { %v1537_v13 = vadd.f32 %v1654_v11, %v1529_v12 }
 0x944   : > { %1538 = vst.msk [vmem:[%s455_s15] sm:$0xff] %vm468_vm1, %v1537_v13 }
 0x945   : > { %1908 = shalt.err (!%p1905_p10)
}
 0x946   : > { %s1909_s17 = scalar_lea.hbm %s1551_s24, 128  ;;  %s1913_s19 = scalar_lea.hbm %s2397_s23, 256 }
 0x947   : > { %p1910_p2 = scmp.ne.s32.totalorder %s1551_s24, %s1909_s17  ;;  %p1914_p7 = scmp.lt.s32.totalorder %s1551_s24, %s2397_s23 }
 0x948   : > { %p1915_p0 = scmp.lt.s32.totalorder %s1913_s19, %s1909_s17 }
 0x949   : > { %p1911_p4 = pnand %p1910_p2, %p2398_p12 }
 0x94a   : > { %p1916_p6 = por %p1915_p0, %p1914_p7 }
 0x94b   : > { %p1912_p9 = pneg %p1911_p4 }
 0x94d   : > { %p1917_p11 = pnand %p1916_p6, %p1912_p9 }
 0x94f   : > { %1920 = shalt.err (!%p1917_p11)
}
 0x950   : > { %1793 = dma.vmem_to_hbm [thread:$0]  (%p2398_p12), %s1554_s16, 128, %s1551_s24, %s1540_s25  }
 0x951 PF: > { %s2399_s30 = sld [smem:[#allocation8_spill]]  ;;  %p2402_p1 = scmp.ge.s32.totalorder %s1959_s28, 2 }
 0x952   : > { %s2400_s27 = sld [smem:[#allocation12_spill]] }
 0x957   : > { %s1565_s14 = sand.u32 1, %s2399_s30  }
 0x958   : > { %p2401_p13 = scmp.ne.s32.totalorder %s2400_s27, 0  ;;  %s1566_s29 = scalar_lea.sflag [#allocation4], %s1565_s14 }
 0x95a   : > { %p1800_p3 = pnand %p2402_p1, %p2401_p13 }
 0x95c   : > { %p1801_p5 = pneg %p1800_p3 }
 0x95e   : > { %1942 = dma.done.wait (%p1801_p5), %s1566_s29, 128  }
 0x95f   : > { %1944 = vsyncadd (%p1801_p5), %s1566_s29, 4294967168  ;;  %s2403_s28 = sld [smem:[#allocation10_spill]]  ;;  %s2406_s25 = smov %s1951_s26 }
 0x960   : > { %s2404_s13 = sld [smem:[#allocation9_spill]] }
 0x961   : > { %s2405_s27 = sld [smem:[#allocation11_spill]] }
 0x965   : > { %p26_p8 = scmp.ge.s32.totalorder %s2403_s28, 4  }
 0x966   : > { %s2407_s26 = smov %s2404_s13 }
 0x967   :  { %28 = sbr.rel (!%p26_p8) target bundleno = 7 (0x7), region = 117 }
 0x96c   :  { %1571 = vsyncpa [#allocation3], 1 }
 0x96d   :  { %1573 = vsyncpa [#allocation3 + $0x1], 1 }
 0x96e   :  { %1574 = vsyncpa [#allocation4], 1 }
 0x96f   :  { %1576 = vsyncpa [#allocation4 + $0x1], 1 }

</bundles_post_ra>
